<compile_context>
chip_gen: v7x
topology: tpu7x:2x2x1
jax: 0.10.0
libtpu: 0.0.40
codegen_flags: <defaults>
</compile_context>

<pallas_src>
import numpy as np

import jax
import jax.numpy as jnp
from jax.experimental import pallas as pl
from jax.experimental.pallas import tpu as pltpu

# ----------------------------- configuration --------------------------------
W_OUT = 16
H_OUT = 16
F_LAST = 8
NUM_UP_LAYERS = 2
CODE_SIZE = 32
N_LIS_LAYERS = 2
BATCH = 2
DTYPE = jnp.float32          # activation / output dtype
WDTYPE = jnp.bfloat16        # MXU operand dtype for all weight matrices

# bf16 weight blob layout (rows x 768 lanes), all slices (16,128)-tile aligned:
#   rows   0:512, cols   0:768 -> c2m   (512, 768)   final ConvT scatter matrix
#   rows 512:768, cols   0:512 -> c1m   (256, 512)   first ConvT scatter matrix
#   rows 512:544, cols 512:768 -> iw    ( 32, 256)   initial Linear
#   rows 544:576, cols 512:640 -> [lw1_0 | lw2_0 | lw1_1 | lw2_1]   (32, 128)
WBLOB_ROWS = 768
WBLOB_COLS = 768

# f32 aux blob (8, 768):
#   row 0: c2b (768)        row 1: c1b (512)   row 2: c1a (512)
#   row 3: ib  (256)        row 4: ia  (256)
#   row 5: [lb1_0 | la1_0 | lb2_0 | lb1_1 | la1_1 | lb2_1]  (6*32)
AUX_ROWS = 8


# --------------------------- fused Pallas kernel -----------------------------
def _fused_generator_kernel(x_ref, w_ref, aux_ref, lis_ref, img_ref):
    """Whole GeneratorLearnedInputSpace forward in one kernel body.

    Activations are (Bp, features), features channel-major (c*H*W + h*W + w),
    matching PyTorch NCHW .view order throughout.
    """
    x = x_ref[...]                                     # (Bp, 32) f32
    aux = aux_ref[...]                                 # (8, 768) f32
    bp = x.shape[0]

    # ---- residual lis blocks: x = x + Linear2(PReLU(Linear1(x))) -----------
    lis_w = w_ref[544:576, 512:640]                    # (32, 128) bf16
    lis_b = aux[5:6, :]                                # (1, 768) f32
    outs = []
    for i in range(N_LIS_LAYERS):                      # static unroll
        w1 = lis_w[:, 64 * i:64 * i + 32]
        w2 = lis_w[:, 64 * i + 32:64 * i + 64]
        b1 = lis_b[:, 96 * i:96 * i + 32]
        a1 = lis_b[:, 96 * i + 32:96 * i + 64]
        b2 = lis_b[:, 96 * i + 64:96 * i + 96]
        h = jnp.dot(x.astype(WDTYPE), w1,
                    preferred_element_type=jnp.float32) + b1
        h = jnp.where(h >= 0.0, h, a1 * h)             # per-feature PReLU
        x = x + jnp.dot(h.astype(WDTYPE), w2,
                        preferred_element_type=jnp.float32) + b2
        outs.append(x)
    # One lane-dense (Bp, 128) store for all lis results.
    pad_lanes = 128 - N_LIS_LAYERS * CODE_SIZE
    lis_ref[...] = jnp.concatenate(
        outs + [jnp.zeros((bp, pad_lanes), jnp.float32)], axis=-1
    ).astype(lis_ref.dtype)

    # ---- initial Linear + View(f,h,w) + per-channel PReLU -------------------
    y = jnp.dot(x.astype(WDTYPE), w_ref[512:544, 512:768],
                preferred_element_type=jnp.float32) + aux[3:4, 0:256]
    y = jnp.where(y >= 0.0, y, aux[4:5, 0:256] * y)    # (Bp, 16*4*4)

    # ---- ConvTranspose2d #1 (folded scatter GEMM) + PReLU -------------------
    y = jnp.dot(y.astype(WDTYPE), w_ref[512:768, 0:512],
                preferred_element_type=jnp.float32) + aux[1:2, 0:512]
    y = jnp.where(y >= 0.0, y, aux[2:3, 0:512] * y)    # (Bp, 8*8*8)

    # ---- final ConvTranspose2d (folded scatter GEMM) + Sigmoid --------------
    z = jnp.dot(y.astype(WDTYPE), w_ref[0:512, :],
                preferred_element_type=jnp.float32) + aux[0:1, :]
    img_ref[...] = pl.reciprocal(1.0 + jnp.exp(-z),
                                 approx=True).astype(img_ref.dtype)


# --------------------------- pallas_call plumbing ----------------------------
@jax.jit
def generator_forward(x, params):
    """Eval-mode forward: (image (B,3,H_OUT,W_OUT) NCHW, lis_results list)."""
    b = x.shape[0]
    bp = max(8, -(-b // 8) * 8)                        # pad batch to full sublanes
    x_pad = jnp.pad(x.astype(DTYPE), ((0, bp - b), (0, 0)))

    out_shapes = (
        jax.ShapeDtypeStruct((bp, 128), DTYPE),               # packed lis results
        jax.ShapeDtypeStruct((bp, 3 * H_OUT * W_OUT), DTYPE),  # flat NCHW image
    )
    vmem = pltpu.MemorySpace.VMEM
    lis_pack, img_flat = pl.pallas_call(
        _fused_generator_kernel,
        in_specs=[pl.BlockSpec(memory_space=vmem)] * 3,
        out_specs=(pl.BlockSpec(memory_space=vmem),
                   pl.BlockSpec(memory_space=vmem)),
        out_shape=out_shapes,
    )(x_pad, params["wblob"], params["aux"])

    img = img_flat[:b].reshape(b, 3, H_OUT, W_OUT)     # contiguous -> NCHW
    lis_results = [lis_pack[:b, i * CODE_SIZE:(i + 1) * CODE_SIZE]
                   for i in range(N_LIS_LAYERS)]
    return img, lis_results


# ----------------------------- model setup -----------------------------------
def derive_geometry(w_out, h_out, f_last, num_up_layers):
    pad_w, pad_h = [], []
    w, h, f = w_out, h_out, f_last
    for _ in range(num_up_layers - 1):
        if w % 4 == 2:
            pad_w.append(1); w = (w + 2) // 2
        else:
            pad_w.append(0); w = w // 2
        if h % 4 == 2:
            pad_h.append(1); h = (h + 2) // 2
        else:
            pad_h.append(0); h = h // 2
        f = f * 2
    w //= 2
    h //= 2
    pad_w.append(0)
    pad_h.append(0)
    return w, h, f, pad_w, pad_h


def _convt_scatter_matrix(wt, H, W, stride, pad):
    """Fold ConvTranspose2d(stride, pad) on an HxW input into a dense matrix.

    wt: (Cin, Cout, K, K) PyTorch ConvTranspose2d weight (numpy, f32).
    Returns M of shape (Cin*H*W, Cout*Ho*Wo) with channel-major flattening on
    both sides so that  y_flat = x_flat @ M  equals the transposed conv
    (oh = stride*ih + kh - pad_h, ow = stride*iw + kw - pad_w).
    """
    Cin, Cout, K, _ = wt.shape
    ph, pw = pad
    Ho = (H - 1) * stride - 2 * ph + K
    Wo = (W - 1) * stride - 2 * pw + K
    M = np.zeros((Cin, H, W, Cout, Ho, Wo), np.float32)
    for kh in range(K):
        for kw in range(K):
            for ih in range(H):
                oh = stride * ih + kh - ph
                if oh < 0 or oh >= Ho:
                    continue
                for iw in range(W):
                    ow = stride * iw + kw - pw
                    if ow < 0 or ow >= Wo:
                        continue
                    M[:, ih, iw, :, oh, ow] += wt[:, :, kh, kw]
    return M.reshape(Cin * H * W, Cout * Ho * Wo), Ho, Wo


def init_params(key):
    assert NUM_UP_LAYERS == 2, "fused kernel is specialized to 2 upsampling stages"
    w0, h0, f0, pad_w, pad_h = derive_geometry(W_OUT, H_OUT, F_LAST, NUM_UP_LAYERS)
    n0 = f0 * h0 * w0
    assert (f0, h0, w0, n0) == (16, 4, 4, 256), (f0, h0, w0, n0)
    assert 512 + 64 * N_LIS_LAYERS <= WBLOB_COLS

    keys = iter(jax.random.split(key, 64))

    def nrm(shape, scale):
        return np.asarray(scale * jax.random.normal(next(keys), shape, jnp.float32))

    # ---- raw parameters ------------------------------------------------------
    lw1 = [nrm((CODE_SIZE, CODE_SIZE), 0.05) for _ in range(N_LIS_LAYERS)]
    lb1 = [nrm((CODE_SIZE,), 0.01) for _ in range(N_LIS_LAYERS)]
    la1 = [np.full((CODE_SIZE,), 0.25, np.float32) for _ in range(N_LIS_LAYERS)]
    lw2 = [nrm((CODE_SIZE, CODE_SIZE), 0.05) for _ in range(N_LIS_LAYERS)]
    lb2 = [nrm((CODE_SIZE,), 0.01) for _ in range(N_LIS_LAYERS)]

    iw = nrm((CODE_SIZE, n0), 0.05)
    ib = nrm((n0,), 0.01)
    ia = np.repeat(np.full((f0,), 0.25, np.float32), h0 * w0)        # channel-major

    level = NUM_UP_LAYERS - 1
    wt1 = nrm((f0, f0 // 2, 4, 4), 0.05)
    m1, Ho1, Wo1 = _convt_scatter_matrix(
        wt1, h0, w0, 2, (1 + pad_h[level], 1 + pad_w[level]))
    c1b = np.repeat(nrm((f0 // 2,), 0.01), Ho1 * Wo1)
    c1a = np.repeat(np.full((f0 // 2,), 0.25, np.float32), Ho1 * Wo1)

    wt2 = nrm((f0 // 2, 3, 4, 4), 0.05)
    m2, Ho2, Wo2 = _convt_scatter_matrix(
        wt2, Ho1, Wo1, 2, (1 + pad_h[0], 1 + pad_w[0]))
    assert (Ho2, Wo2) == (H_OUT, W_OUT)
    assert m1.shape == (256, 512) and m2.shape == (512, 768)

    # ---- packed bf16 weight blob (one DMA) -----------------------------------
    wblob = np.zeros((WBLOB_ROWS, WBLOB_COLS), np.float32)
    wblob[0:512, 0:768] = m2
    wblob[512:768, 0:512] = m1
    wblob[512:544, 512:768] = iw
    for i in range(N_LIS_LAYERS):
        c = 512 + 64 * i
        wblob[544:576, c:c + 32] = lw1[i]
        wblob[544:576, c + 32:c + 64] = lw2[i]

    # ---- packed f32 bias / alpha blob (one DMA) -------------------------------
    aux = np.zeros((AUX_ROWS, WBLOB_COLS), np.float32)
    aux[0, 0:768] = np.repeat(nrm((3,), 0.01), Ho2 * Wo2)   # c2b, channel-major
    aux[1, 0:512] = c1b
    aux[2, 0:512] = c1a
    aux[3, 0:n0] = ib
    aux[4, 0:n0] = ia
    for i in range(N_LIS_LAYERS):
        c = 96 * i
        aux[5, c:c + 32] = lb1[i]
        aux[5, c + 32:c + 64] = la1[i]
        aux[5, c + 64:c + 96] = lb2[i]

    return {"wblob": jnp.asarray(wblob, WDTYPE),
            "aux": jnp.asarray(aux, jnp.float32)}


# --------------------------------- main --------------------------------------
if __name__ == "__main__":
    x = jax.random.normal(jax.random.PRNGKey(0), (BATCH, CODE_SIZE), DTYPE)
    params = init_params(jax.random.PRNGKey(1))

    img, lis_results = generator_forward(x, params)
    img = jax.block_until_ready(img)
    for r in lis_results:
        jax.block_until_ready(r)

    assert img.shape == (BATCH, 3, H_OUT, W_OUT), img.shape
    assert len(lis_results) == N_LIS_LAYERS
    assert all(r.shape == (BATCH, CODE_SIZE) for r in lis_results)
    assert bool(jnp.all(jnp.isfinite(img)))
    print("KERNEL_OK")
</pallas_src>

<mosaic_0001>
module attributes {stable_mosaic.version = 11 : i64} {
  func.func @_fused_generator_kernel(%arg0: memref<8x32xf32, #tpu.memory_space<vmem>>, %arg1: memref<768x768xbf16, #tpu.memory_space<vmem>>, %arg2: memref<8x768xf32, #tpu.memory_space<vmem>>, %arg3: memref<8x128xf32, #tpu.memory_space<vmem>>, %arg4: memref<8x768xf32, #tpu.memory_space<vmem>>) attributes {dimension_semantics = [], scalar_prefetch = 0 : i64, scratch_operands = 0 : i64, tpu.core_type = #tpu.core_type<tc>} {
    %c0 = arith.constant 0 : index
    %c0_0 = arith.constant 0 : index
    %0 = vector.load %arg0[%c0, %c0_0] : memref<8x32xf32, #tpu.memory_space<vmem>>, vector<8x32xf32>
    %c0_1 = arith.constant 0 : index
    %c0_2 = arith.constant 0 : index
    %1 = vector.load %arg2[%c0_1, %c0_2] : memref<8x768xf32, #tpu.memory_space<vmem>>, vector<8x768xf32>
    %c544 = arith.constant 544 : index
    %c512 = arith.constant 512 : index
    %2 = vector.load %arg1[%c544, %c512] : memref<768x768xbf16, #tpu.memory_space<vmem>>, vector<32x128xbf16>
    %3 = vector.extract_strided_slice %1 {offsets = [5, 0], sizes = [1, 768], strides = [1, 1]} : vector<8x768xf32> to vector<1x768xf32>
    %4 = vector.extract_strided_slice %2 {offsets = [0, 0], sizes = [32, 32], strides = [1, 1]} : vector<32x128xbf16> to vector<32x32xbf16>
    %5 = vector.extract_strided_slice %2 {offsets = [0, 32], sizes = [32, 32], strides = [1, 1]} : vector<32x128xbf16> to vector<32x32xbf16>
    %6 = vector.extract_strided_slice %3 {offsets = [0, 0], sizes = [1, 32], strides = [1, 1]} : vector<1x768xf32> to vector<1x32xf32>
    %7 = vector.extract_strided_slice %3 {offsets = [0, 32], sizes = [1, 32], strides = [1, 1]} : vector<1x768xf32> to vector<1x32xf32>
    %8 = vector.extract_strided_slice %3 {offsets = [0, 64], sizes = [1, 32], strides = [1, 1]} : vector<1x768xf32> to vector<1x32xf32>
    %9 = arith.truncf %0 : vector<8x32xf32> to vector<8x32xbf16>
    %cst = arith.constant dense<0.000000e+00> : vector<8x32xf32>
    %10 = tpu.matmul %9, %4, %cst {dimension_numbers = #tpu.dot_dimension_numbers<[1], [0], [0], [1], [0, 0, 1, 1], [], []>} : vector<8x32xbf16>, vector<32x32xbf16>, vector<8x32xf32> -> vector<8x32xf32>
    %11 = vector.broadcast %6 : vector<1x32xf32> to vector<8x32xf32>
    %12 = arith.addf %10, %11 : vector<8x32xf32>
    %cst_3 = arith.constant 0.000000e+00 : f32
    %13 = vector.broadcast %cst_3 : f32 to vector<8x32xf32>
    %14 = arith.cmpf oge, %12, %13 : vector<8x32xf32>
    %15 = vector.broadcast %7 : vector<1x32xf32> to vector<8x32xf32>
    %16 = arith.mulf %15, %12 : vector<8x32xf32>
    %17 = arith.select %14, %12, %16 : vector<8x32xi1>, vector<8x32xf32>
    %18 = arith.truncf %17 : vector<8x32xf32> to vector<8x32xbf16>
    %cst_4 = arith.constant dense<0.000000e+00> : vector<8x32xf32>
    %19 = tpu.matmul %18, %5, %cst_4 {dimension_numbers = #tpu.dot_dimension_numbers<[1], [0], [0], [1], [0, 0, 1, 1], [], []>} : vector<8x32xbf16>, vector<32x32xbf16>, vector<8x32xf32> -> vector<8x32xf32>
    %20 = arith.addf %0, %19 : vector<8x32xf32>
    %21 = vector.broadcast %8 : vector<1x32xf32> to vector<8x32xf32>
    %22 = arith.addf %20, %21 : vector<8x32xf32>
    %23 = vector.extract_strided_slice %2 {offsets = [0, 64], sizes = [32, 32], strides = [1, 1]} : vector<32x128xbf16> to vector<32x32xbf16>
    %24 = vector.extract_strided_slice %2 {offsets = [0, 96], sizes = [32, 32], strides = [1, 1]} : vector<32x128xbf16> to vector<32x32xbf16>
    %25 = vector.extract_strided_slice %3 {offsets = [0, 96], sizes = [1, 32], strides = [1, 1]} : vector<1x768xf32> to vector<1x32xf32>
    %26 = vector.extract_strided_slice %3 {offsets = [0, 128], sizes = [1, 32], strides = [1, 1]} : vector<1x768xf32> to vector<1x32xf32>
    %27 = vector.extract_strided_slice %3 {offsets = [0, 160], sizes = [1, 32], strides = [1, 1]} : vector<1x768xf32> to vector<1x32xf32>
    %28 = arith.truncf %22 : vector<8x32xf32> to vector<8x32xbf16>
    %cst_5 = arith.constant dense<0.000000e+00> : vector<8x32xf32>
    %29 = tpu.matmul %28, %23, %cst_5 {dimension_numbers = #tpu.dot_dimension_numbers<[1], [0], [0], [1], [0, 0, 1, 1], [], []>} : vector<8x32xbf16>, vector<32x32xbf16>, vector<8x32xf32> -> vector<8x32xf32>
    %30 = vector.broadcast %25 : vector<1x32xf32> to vector<8x32xf32>
    %31 = arith.addf %29, %30 : vector<8x32xf32>
    %cst_6 = arith.constant 0.000000e+00 : f32
    %32 = vector.broadcast %cst_6 : f32 to vector<8x32xf32>
    %33 = arith.cmpf oge, %31, %32 : vector<8x32xf32>
    %34 = vector.broadcast %26 : vector<1x32xf32> to vector<8x32xf32>
    %35 = arith.mulf %34, %31 : vector<8x32xf32>
    %36 = arith.select %33, %31, %35 : vector<8x32xi1>, vector<8x32xf32>
    %37 = arith.truncf %36 : vector<8x32xf32> to vector<8x32xbf16>
    %cst_7 = arith.constant dense<0.000000e+00> : vector<8x32xf32>
    %38 = tpu.matmul %37, %24, %cst_7 {dimension_numbers = #tpu.dot_dimension_numbers<[1], [0], [0], [1], [0, 0, 1, 1], [], []>} : vector<8x32xbf16>, vector<32x32xbf16>, vector<8x32xf32> -> vector<8x32xf32>
    %39 = arith.addf %22, %38 : vector<8x32xf32>
    %40 = vector.broadcast %27 : vector<1x32xf32> to vector<8x32xf32>
    %41 = arith.addf %39, %40 : vector<8x32xf32>
    %cst_8 = arith.constant 0.000000e+00 : f32
    %42 = vector.broadcast %cst_8 : f32 to vector<8x64xf32>
    %43 = tpu.concatenate %22, %41, %42 in 1 : vector<8x32xf32>, vector<8x32xf32>, vector<8x64xf32> -> vector<8x128xf32>
    %c0_9 = arith.constant 0 : index
    %c0_10 = arith.constant 0 : index
    %44 = vector.load %arg3[%c0_9, %c0_10] : memref<8x128xf32, #tpu.memory_space<vmem>>, vector<8x128xf32>
    tpu.vector_store %arg3[%c0_9, %c0_10], %43 {strides = array<i32>} : memref<8x128xf32, #tpu.memory_space<vmem>>, vector<8x128xf32>,
    %45 = arith.truncf %41 : vector<8x32xf32> to vector<8x32xbf16>
    %c512_11 = arith.constant 512 : index
    %c512_12 = arith.constant 512 : index
    %46 = vector.load %arg1[%c512_11, %c512_12] : memref<768x768xbf16, #tpu.memory_space<vmem>>, vector<32x256xbf16>
    %cst_13 = arith.constant dense<0.000000e+00> : vector<8x256xf32>
    %47 = tpu.matmul %45, %46, %cst_13 {dimension_numbers = #tpu.dot_dimension_numbers<[1], [0], [0], [1], [0, 0, 1, 1], [], []>} : vector<8x32xbf16>, vector<32x256xbf16>, vector<8x256xf32> -> vector<8x256xf32>
    %48 = vector.extract_strided_slice %1 {offsets = [3, 0], sizes = [1, 256], strides = [1, 1]} : vector<8x768xf32> to vector<1x256xf32>
    %49 = vector.broadcast %48 : vector<1x256xf32> to vector<8x256xf32>
    %50 = arith.addf %47, %49 : vector<8x256xf32>
    %cst_14 = arith.constant 0.000000e+00 : f32
    %51 = vector.broadcast %cst_14 : f32 to vector<8x256xf32>
    %52 = arith.cmpf oge, %50, %51 : vector<8x256xf32>
    %53 = vector.extract_strided_slice %1 {offsets = [4, 0], sizes = [1, 256], strides = [1, 1]} : vector<8x768xf32> to vector<1x256xf32>
    %54 = vector.broadcast %53 : vector<1x256xf32> to vector<8x256xf32>
    %55 = arith.mulf %54, %50 : vector<8x256xf32>
    %56 = arith.select %52, %50, %55 : vector<8x256xi1>, vector<8x256xf32>
    %57 = arith.truncf %56 : vector<8x256xf32> to vector<8x256xbf16>
    %c512_15 = arith.constant 512 : index
    %c0_16 = arith.constant 0 : index
    %58 = vector.load %arg1[%c512_15, %c0_16] : memref<768x768xbf16, #tpu.memory_space<vmem>>, vector<256x512xbf16>
    %cst_17 = arith.constant dense<0.000000e+00> : vector<8x512xf32>
    %59 = tpu.matmul %57, %58, %cst_17 {dimension_numbers = #tpu.dot_dimension_numbers<[1], [0], [0], [1], [0, 0, 1, 1], [], []>} : vector<8x256xbf16>, vector<256x512xbf16>, vector<8x512xf32> -> vector<8x512xf32>
    %60 = vector.extract_strided_slice %1 {offsets = [1, 0], sizes = [1, 512], strides = [1, 1]} : vector<8x768xf32> to vector<1x512xf32>
    %61 = vector.broadcast %60 : vector<1x512xf32> to vector<8x512xf32>
    %62 = arith.addf %59, %61 : vector<8x512xf32>
    %cst_18 = arith.constant 0.000000e+00 : f32
    %63 = vector.broadcast %cst_18 : f32 to vector<8x512xf32>
    %64 = arith.cmpf oge, %62, %63 : vector<8x512xf32>
    %65 = vector.extract_strided_slice %1 {offsets = [2, 0], sizes = [1, 512], strides = [1, 1]} : vector<8x768xf32> to vector<1x512xf32>
    %66 = vector.broadcast %65 : vector<1x512xf32> to vector<8x512xf32>
    %67 = arith.mulf %66, %62 : vector<8x512xf32>
    %68 = arith.select %64, %62, %67 : vector<8x512xi1>, vector<8x512xf32>
    %69 = arith.truncf %68 : vector<8x512xf32> to vector<8x512xbf16>
    %c0_19 = arith.constant 0 : index
    %c0_20 = arith.constant 0 : index
    %70 = vector.load %arg1[%c0_19, %c0_20] : memref<768x768xbf16, #tpu.memory_space<vmem>>, vector<512x768xbf16>
    %cst_21 = arith.constant dense<0.000000e+00> : vector<8x768xf32>
    %71 = tpu.matmul %69, %70, %cst_21 {dimension_numbers = #tpu.dot_dimension_numbers<[1], [0], [0], [1], [0, 0, 1, 1], [], []>} : vector<8x512xbf16>, vector<512x768xbf16>, vector<8x768xf32> -> vector<8x768xf32>
    %72 = vector.extract_strided_slice %1 {offsets = [0, 0], sizes = [1, 768], strides = [1, 1]} : vector<8x768xf32> to vector<1x768xf32>
    %73 = vector.broadcast %72 : vector<1x768xf32> to vector<8x768xf32>
    %74 = arith.addf %71, %73 : vector<8x768xf32>
    %cst_22 = arith.constant 0.000000e+00 : f32
    %75 = vector.broadcast %cst_22 : f32 to vector<8x768xf32>
    %76 = arith.subf %75, %74 : vector<8x768xf32>
    %77 = math.exp %76 : vector<8x768xf32>
    %cst_23 = arith.constant 1.000000e+00 : f32
    %78 = vector.broadcast %cst_23 : f32 to vector<8x768xf32>
    %79 = arith.addf %78, %77 : vector<8x768xf32>
    %80 = tpu.reciprocal %79 {approx = true} : vector<8x768xf32> -> vector<8x768xf32>
    %c0_24 = arith.constant 0 : index
    %c0_25 = arith.constant 0 : index
    %81 = vector.load %arg4[%c0_24, %c0_25] : memref<8x768xf32, #tpu.memory_space<vmem>>, vector<8x768xf32>
    tpu.vector_store %arg4[%c0_24, %c0_25], %80 {strides = array<i32>} : memref<8x768xf32, #tpu.memory_space<vmem>>, vector<8x768xf32>,
    return
  }
}

</mosaic_0001>

<bundles_post_ra>
// kernel: generator_forward.1
= control target key start
LH: loop header
LB: loop body
LE: loop exit
PB: predicated region body
PF: predicated region fallthrough
CT: control target
= control target key end

     0   :  { %10 = vsyncpa [#allocation3], 0  ;;  %s3362_s0 = inlined_call_operand.vmem [shape: f32[8,32], index: 0, kind: input, shape index: {}]   ;;  %s3363_s1 = inlined_call_operand.hbm [shape: bf16[768,768], index: 1, kind: input, shape index: {}]   ;;  %s3364_s2 = inlined_call_operand.hbm [shape: f32[8,768], index: 2, kind: input, shape index: {}]   ;;  %s3365_s3 = inlined_call_operand.vmem [shape: f32[8,128], index: 3, kind: output, shape index: {0}]   ;;  %s3366_s4 = inlined_call_operand.vmem [shape: f32[8,768], index: 4, kind: output, shape index: {1}]  }
   0x1   :  { %11 = vsyncpa [#allocation5], 0  ;;  %s3186_s15 = smov [#allocation2]   ;;  %s3138_s19 = scalar_lea.hbm %s3363_s1, 36864 }
   0x2   :  { %s19_s16 = sshll.u32 %s3186_s15, 4  ;;  %p3139_p0 = scmp.ne.s32.totalorder %s3363_s1, %s3138_s19  ;;  %s20_s16 = int_to_ptr.vmem [resolvable:$true] %s19_s16 }
   0x3   :  { %p3142_p1 = scmp.lt.u32.totalorder %s3138_s19, %s3363_s1 }
   0x5   :  { %p3144_p2 = pnand %p3142_p1, %p3139_p0 }
   0x7   :  { %3147 = shalt.err (!%p3144_p2)
}
   0x8   :  { %s3148_s24 = scalar_lea.vmem %s20_s16, 36864  ;;  %p3153_p4 = scmp.lt.s32.totalorder %s20_s16, %s20_s16 }
   0x9   :  { %p3149_p3 = scmp.ne.s32.totalorder %s20_s16, %s3148_s24  ;;  %p3154_p5 = scmp.lt.s32.totalorder %s3148_s24, %s3148_s24 }
   0xb   :  { %p3155_p6 = por %p3154_p5, %p3153_p4 }
   0xd   :  { %p3156_p7 = pnand %p3155_p6, %p3149_p3 }
   0xf   :  { %3159 = shalt.err (!%p3156_p7)
}
  0x10   :  { %s3187_s25 = smov 384   ;;  %s3188_s26 = smov 24  }
  0x11   :  { %25 = dma.hbm_to_vmem [thread:$0]  %s3363_s1, 36864, %s20_s16, [#allocation3], %s3187_s25, %s3187_s25, %s3188_s26  }
  0x12   :  { %s3189_s29 = smov [#allocation4]   ;;  %s3160_s7 = scalar_lea.hbm %s3364_s2, 768 }
  0x13   :  { %s32_s30 = sshll.u32 %s3189_s29, 4  ;;  %p3161_p8 = scmp.ne.s32.totalorder %s3364_s2, %s3160_s7  ;;  %s33_s30 = int_to_ptr.vmem [resolvable:$true] %s32_s30 }
  0x14   :  { %p3164_p9 = scmp.lt.u32.totalorder %s3160_s7, %s3364_s2 }
  0x16   :  { %p3166_p10 = pnand %p3164_p9, %p3161_p8 }
  0x18   :  { %3169 = shalt.err (!%p3166_p10)
}
  0x19   :  { %s3170_s12 = scalar_lea.vmem %s33_s30, 768  ;;  %p3175_p12 = scmp.lt.s32.totalorder %s33_s30, %s33_s30 }
  0x1a   :  { %p3171_p11 = scmp.ne.s32.totalorder %s33_s30, %s3170_s12  ;;  %p3176_p13 = scmp.lt.s32.totalorder %s3170_s12, %s3170_s12 }
  0x1c   :  { %p3177_p0 = por %p3176_p13, %p3175_p12 }
  0x1e   :  { %p3178_p1 = pnand %p3177_p0, %p3171_p11 }
  0x20   :  { %3181 = shalt.err (!%p3178_p1)
}
  0x21   :  { %35 = dma.hbm_to_vmem [thread:$0]  %s3364_s2, 768, %s33_s30, [#allocation5]  }
  0x22   :  { %3182 = dma.done.wait [#allocation3], 36864  }
  0x23   :  { %3183 = vsyncadd [#allocation3], 4294930432 }
  0x24   :  { %3184 = dma.done.wait [#allocation5], 768  }
  0x25   :  { %3185 = vsyncadd [#allocation5], 4294966528  ;;  %v3190_v0 = vmov 0.0   ;;  %vm3191_vm0 = vmmov 0   ;;  %v2720_v1 = vld [vmem:[#allocation2 + $0x670] ss:$24 sps:$4 sm:$0xff]   ;;  %v55_v5 = vlaneseq }
  0x26   :  { %2660 = vmatprep.subr.bf16.mxu0 %v3190_v0  ;;  %2664 = vmatprep.mubr.msk.bf16.mxu0 %vm3191_vm0, %v3190_v0  ;;  %v2721_v2 = vld [vmem:[#allocation2 + $0x6a0] ss:$24 sps:$4 sm:$0xff]   ;;  %vm71_vm1 = vcmask 261120   ;;  %s3193_s2 = smov 96   ;;  %s3194_s16 = smov 64   ;;  %v3272_v34 = vld [vmem:[#allocation4 + $0x8] sm:$0xff] }
  0x27   :  { %2668 = vmatprep.subr.bf16.mxu1 %v3190_v0  ;;  %2672 = vmatprep.mubr.msk.bf16.mxu1 %vm3191_vm0, %v3190_v0  ;;  %v43_v3 = vld [vmem:[%s3362_s0] sm:$0xff]  ;;  %v3252_v6 = vshrl.u32 %v55_v5, 7  ;;  %s3192_s0 = smov 32   ;;  %v2722_v37 = vld [vmem:[#allocation2 + $0x610] ss:$24 sps:$4 sm:$0xff]   ;;  %v3195_v49 = vmov 0  }
  0x28   :  { %2661 = vmatpush3.bf16.msra.mxu0 %v2720_v1  ;;  %v54_v4 = vpack.c.bf16 %v43_v3, %v43_v3  ;;  %v3255_v8 = vld [vmem:[#allocation4] sm:$0xff]  ;;  %v2724_v38 = vld [vmem:[#allocation2 + $0x614] ss:$24 sps:$4 sm:$0xff]   ;;  %v2731_v61 = vld [vmem:[#allocation2 + $0x630] ss:$24 sps:$4 sm:$0xff]   ;;  %vm303_vm4 = vcmask 523264  }
  0x29   :  { %2662 = vmatprep.subr.bf16.mxu0 %v3190_v0  ;;  %v57_v7 = vsub.s32 5, %v3252_v6  ;;  %v2727_v47 = vld [vmem:[#allocation2 + $0x644] ss:$24 sps:$4 sm:$0xff]   ;;  %v2725_v48 = vld [vmem:[#allocation2 + $0x640] ss:$24 sps:$4 sm:$0xff]  }
  0x2a   :  { %v2730_v50 = vld [vmem:[#allocation2 + $0x604] ss:$24 sps:$4 sm:$0xff]   ;;  %v2728_v58 = vld [vmem:[#allocation2 + $0x600] ss:$24 sps:$4 sm:$0xff]   ;;  %v2733_v60 = vld [vmem:[#allocation2 + $0x634] ss:$24 sps:$4 sm:$0xff]  }
  0x2b   :  { %v58_v9 = vrot.slane %v3255_v8, %v57_v7  ;;  %v239_v35 = vrot.slane %v3272_v34, %v57_v7  ;;  %v2736_v62 = vld [vmem:[#allocation2 + $0x664] ss:$24 sps:$4 sm:$0xff]   ;;  %v2734_v63 = vld [vmem:[#allocation2 + $0x660] ss:$24 sps:$4 sm:$0xff]   ;;  %v2743_v5 = vld [vmem:[#allocation2 + $0x6f0] ss:$24 sps:$4 sm:$0xff]  }
  0x2c   :  { %2663 = vmatpush3.bf16.msra.mxu0 %v2721_v2  ;;  %v2748_v7 = vld [vmem:[#allocation2 + $0x724] ss:$24 sps:$4 sm:$0xff]  }
  0x2d   :  { %2676 = vmatprep.subr.bf16.mxu0 %v3190_v0 }
  0x2f   :  { %2665 = vmatmul.mubr.msk.bf16.vlgmr.msra.gmra.mrb[0].mxu0 %vm71_vm1, %v54_v4  ;;  %v2745_v4 = vld [vmem:[#allocation2 + $0x6f4] ss:$24 sps:$4 sm:$0xff]  }
  0x30   :  { %2680 = vmatprep.mubr.msk.bf16.mxu0 %vm3191_vm0, %v3190_v0 }
 0x102   :  { %v109_v10 = vpop.f32.mrb[0].mxu0 }
 0x103   :  { %v110_v11 = vadd.f32 %v109_v10, %v58_v9  ;;  %v2666_v12 = vpop.f32.mrb[1].mxu0  ;;  %v2751_v10 = vld [vmem:[#allocation2 + $0x754] ss:$24 sps:$4 sm:$0xff]  }
 0x104   :  { %v112_v13 = vpop.f32.mrb[2].mxu0  ;;  %v2754_v12 = vld [vmem:[#allocation2 + $0x784] ss:$24 sps:$4 sm:$0xff]  }
 0x105   :  { %117 = vrot.lane.b32.xlu0 %v110_v11, %s3192_s0  ;;  %v2667_v14 = vpop.f32.mrb[3].mxu0  ;;  %vm115_vm2 = vcmp.ge.f32.partialorder %v110_v11, 0.0  ;;  %v2752_v13 = vld [vmem:[#allocation2 + $0x780] ss:$24 sps:$4 sm:$0xff]  }
 0x106   :  { %v2757_v14 = vld [vmem:[#allocation2 + $0x7b4] ss:$24 sps:$4 sm:$0xff]  }
 0x109   :  { %127 = vrot.lane.b32.xlu0 %v2720_v1, %s3193_s2 }
 0x10d   :  { %183 = vrot.lane.b32.xlu0 %v2720_v1, %s3194_s16 }
 0x111   :  { %185 = vrot.lane.b32.xlu0 %v2721_v2, %s3194_s16 }
 0x115   :  { %243 = vrot.lane.b32.xlu0 %v2720_v1, %s3192_s0  ;;  %v2737_v1 = vld [vmem:[#allocation2 + $0x690] ss:$24 sps:$4 sm:$0xff]  }
 0x119   :  { %294 = vrot.lane.b32.xlu0 %v239_v35, %s3193_s2 }
 0x177   :  { %v118_v15 = vpop.permute.xlu0 %117 }
 0x178   :  { %v120_v16 = vmul.f32 %v118_v15, %v58_v9  ;;  %v2755_v15 = vld [vmem:[#allocation2 + $0x7b0] ss:$24 sps:$4 sm:$0xff]  }
 0x17a   :  { %122 = vrot.lane.b32.xlu1 %v120_v16, %s3193_s2  ;;  %v2760_v16 = vld [vmem:[#allocation2 + $0x7e4] ss:$24 sps:$4 sm:$0xff]  }
 0x17b   :  { %v128_v17 = vpop.permute.xlu0 %127 }
 0x17c   :  { %2669 = vmatpush3.bf16.msra.mxu1 %v128_v17  ;;  %v2758_v17 = vld [vmem:[#allocation2 + $0x7e0] ss:$24 sps:$4 sm:$0xff]  }
 0x17d   :  { %2670 = vmatprep.subr.bf16.mxu1 %v3190_v0 }
 0x17e   :  { %129 = vrot.lane.b32.xlu1 %v2721_v2, %s3193_s2 }
 0x17f   :  { %v184_v18 = vpop.permute.xlu0 %183 }
 0x180   :  { %2677 = vmatpush3.bf16.msra.mxu0 %v184_v18  ;;  %v2763_v18 = vld [vmem:[#allocation2 + $0x814] ss:$24 sps:$4 sm:$0xff]  }
 0x181   :  { %2678 = vmatprep.subr.bf16.mxu0 %v3190_v0 }
 0x182   :  { %178 = vrot.lane.b32.xlu1 %v58_v9, %s3194_s16 }
 0x183   :  { %v186_v23 = vpop.permute.xlu0 %185 }
 0x184   :  { %2679 = vmatpush3.bf16.msra.mxu0 %v186_v23  ;;  %v2767_v23 = vld [vmem:[#allocation2 + $0x870] ss:$24 sps:$4 sm:$0xff]  }
 0x185   :  { %342 = vmatprep.subr.bf16.mxu0 %v2724_v38  ;;  %v2838_v38 = vld [vmem:[#allocation2 + $0x64] ss:$24 sps:$4 sm:$0xff]  }
 0x186   :  { %189 = vrot.lane.b32.xlu1 %v58_v9, %s3192_s0  ;;  %v2746_v9 = vld [vmem:[#allocation2 + $0x720] ss:$24 sps:$4 sm:$0xff]  }
 0x187   :  { %v244_v24 = vpop.permute.xlu0 %243 }
 0x18a   :  { %245 = vrot.lane.b32.xlu1 %v2721_v2, %s3192_s0  ;;  %v2742_v2 = vld [vmem:[#allocation2 + $0x6c4] ss:$24 sps:$4 sm:$0xff]  }
 0x18b   :  { %v295_v52 = vpop.permute.xlu0 %294 }
 0x1ec   :  { %v123_v19 = vpop.permute.xlu1 %122 }
 0x1ed   :  { %v125_v20 = vsel %vm115_vm2, %v110_v11, %v123_v19  ;;  %v2749_v11 = vld [vmem:[#allocation2 + $0x750] ss:$24 sps:$4 sm:$0xff]  }
 0x1ee   :  { %v126_v22 = vpack.c.bf16 %v125_v20, %v125_v20  ;;  %v2761_v19 = vld [vmem:[#allocation2 + $0x810] ss:$24 sps:$4 sm:$0xff]   ;;  %v2766_v20 = vld [vmem:[#allocation2 + $0x844] ss:$24 sps:$4 sm:$0xff]  }
 0x1f0   :  { %v130_v21 = vpop.permute.xlu1 %129 }
 0x1f1   :  { %2671 = vmatpush3.bf16.msra.mxu1 %v130_v21  ;;  %v2764_v21 = vld [vmem:[#allocation2 + $0x840] ss:$24 sps:$4 sm:$0xff]  }
 0x1f2   :  { %2684 = vmatprep.subr.bf16.mxu1 %v3190_v0 }
 0x1f4   :  { %2673 = vmatmul.mubr.msk.bf16.vlgmr.msra.gmra.mrb[0].mxu1 %vm71_vm1, %v126_v22  ;;  %v179_v26 = vpop.permute.xlu1 %178  ;;  %v2769_v22 = vld [vmem:[#allocation2 + $0x874] ss:$24 sps:$4 sm:$0xff]  }
 0x1f5   :  { %2688 = vmatprep.mubr.msk.bf16.mxu1 %vm3191_vm0, %v3190_v0  ;;  %2685 = vmatpush3.bf16.msra.mxu1 %v244_v24  ;;  %v2772_v24 = vld [vmem:[#allocation2 + $0x8a4] ss:$24 sps:$4 sm:$0xff]  }
 0x1f6   :  { %2686 = vmatprep.subr.bf16.mxu1 %v3190_v0  ;;  %v2739_v0 = vld [vmem:[#allocation2 + $0x694] ss:$24 sps:$4 sm:$0xff]  }
 0x1f8   :  { %v190_v33 = vpop.permute.xlu1 %189 }
 0x1fc   :  { %v246_v36 = vpop.permute.xlu1 %245 }
 0x1fd   :  { %2687 = vmatpush3.bf16.msra.mxu1 %v246_v36  ;;  %v2832_v36 = vld [vmem:[#allocation2 + $0x34] ss:$24 sps:$4 sm:$0xff]  }
 0x2c7   :  { %v170_v25 = vpop.f32.mrb[0].mxu1 }
 0x2c8   :  { %v176_v27 = vadd.f32 %v170_v25, %v43_v3  ;;  %v2674_v28 = vpop.f32.mrb[1].mxu1  ;;  %v2740_v3 = vld [vmem:[#allocation2 + $0x6c0] ss:$24 sps:$4 sm:$0xff]  }
 0x2c9   :  { %v173_v29 = vpop.f32.mrb[2].mxu1  ;;  %v2770_v25 = vld [vmem:[#allocation2 + $0x8a0] ss:$24 sps:$4 sm:$0xff]   ;;  %v2778_v28 = vld [vmem:[#allocation2 + $0x60c] ss:$24 sps:$4 sm:$0xff]  }
 0x2ca   :  { %v3267_v30 = vadd.f32 %v179_v26, %v176_v27  ;;  %v2675_v31 = vpop.f32.mrb[3].mxu1  ;;  %v2775_v26 = vld [vmem:[#allocation2 + $0x8d4] ss:$24 sps:$4 sm:$0xff]   ;;  %v2773_v27 = vld [vmem:[#allocation2 + $0x8d0] ss:$24 sps:$4 sm:$0xff]  }
 0x2cc   :  { %v182_v32 = vpack.c.bf16 %v3267_v30, %v3267_v30 }
 0x2ce   :  { %2681 = vmatmul.mubr.msk.bf16.vlgmr.msra.gmra.mrb[4].mxu0 %vm71_vm1, %v182_v32 }
 0x2cf   :  { %343 = vmatpush1.bf16.msra.mxu0 %v2722_v37  ;;  %374 = vmatprep.mubr.bf16.mxu0 %v3195_v49  ;;  %v2830_v37 = vld [vmem:[#allocation2 + $0x30] ss:$24 sps:$4 sm:$0xff]   ;;  %v2874_v49 = vld [vmem:[#allocation2 + $0x184] ss:$24 sps:$4 sm:$0xff]  }
 0x2d0   :  { %344 = vmatprep.subr.bf16.mxu0 %v2727_v47  ;;  %v2868_v47 = vld [vmem:[#allocation2 + $0x154] ss:$24 sps:$4 sm:$0xff]  }
 0x2d3   :  { %345 = vmatpush1.bf16.msra.mxu0 %v2725_v48  ;;  %v2866_v48 = vld [vmem:[#allocation2 + $0x150] ss:$24 sps:$4 sm:$0xff]  }
 0x2d4   :  { %799 = vmatprep.subr.bf16.mxu0 %v2730_v50  ;;  %v2872_v50 = vld [vmem:[#allocation2 + $0x180] ss:$24 sps:$4 sm:$0xff]  }
 0x3a1   :  { %v229_v39 = vpop.f32.mrb[4].mxu0 }
 0x3a2   :  { %v230_v40 = vadd.f32 %v229_v39, %v190_v33  ;;  %v2682_v41 = vpop.f32.mrb[5].mxu0  ;;  %v2824_v33 = vld [vmem:[#allocation2] ss:$24 sps:$4 sm:$0xff]  }
 0x3a3   :  { %v232_v42 = vpop.f32.mrb[6].mxu0  ;;  %v2836_v39 = vld [vmem:[#allocation2 + $0x60] ss:$24 sps:$4 sm:$0xff]   ;;  %v2842_v41 = vld [vmem:[#allocation2 + $0x90] ss:$24 sps:$4 sm:$0xff]  }
 0x3a4   :  { %vm235_vm3 = vcmp.ge.f32.partialorder %v230_v40, 0.0  ;;  %v240_v43 = vmul.f32 %v239_v35, %v230_v40  ;;  %v2683_v44 = vpop.f32.mrb[7].mxu0  ;;  %v2826_v35 = vld [vmem:[#allocation2 + $0x4] ss:$24 sps:$4 sm:$0xff]   ;;  %v2848_v42 = vld [vmem:[#allocation2 + $0xc0] ss:$24 sps:$4 sm:$0xff]  }
 0x3a5   :  { %2089 = vmatprep.subr.bf16.mxu1 %v2826_v35  ;;  %v2854_v44 = vld [vmem:[#allocation2 + $0xf0] ss:$24 sps:$4 sm:$0xff]  }
 0x3a6   :  { %v241_v45 = vsel %vm235_vm3, %v230_v40, %v240_v43  ;;  %v2844_v40 = vld [vmem:[#allocation2 + $0x94] ss:$24 sps:$4 sm:$0xff]   ;;  %v2800_v35 = vld [vmem:[#allocation2 + $0x788] ss:$24 sps:$4 sm:$0xff]  }
 0x3a7   :  { %v242_v46 = vpack.c.bf16 %v241_v45, %v241_v45  ;;  %v2856_v43 = vld [vmem:[#allocation2 + $0xf4] ss:$24 sps:$4 sm:$0xff]   ;;  %v2862_v45 = vld [vmem:[#allocation2 + $0x124] ss:$24 sps:$4 sm:$0xff]  }
 0x3a9   :  { %2689 = vmatmul.mubr.msk.bf16.vlgmr.msra.gmra.mrb[4].mxu1 %vm71_vm1, %v242_v46  ;;  %v2860_v46 = vld [vmem:[#allocation2 + $0x120] ss:$24 sps:$4 sm:$0xff]  }
 0x3aa   :  { %2090 = vmatpush1.bf16.msra.mxu1 %v2824_v33  ;;  %v2802_v33 = vld [vmem:[#allocation2 + $0x78c] ss:$24 sps:$4 sm:$0xff]  }
 0x3ab   :  { %2091 = vmatprep.subr.bf16.mxu1 %v2832_v36  ;;  %v2805_v36 = vld [vmem:[#allocation2 + $0x7bc] ss:$24 sps:$4 sm:$0xff]  }
 0x3ae   :  { %2092 = vmatpush1.bf16.msra.mxu1 %v2830_v37  ;;  %v2803_v37 = vld [vmem:[#allocation2 + $0x7b8] ss:$24 sps:$4 sm:$0xff]  }
 0x3af   :  { %2093 = vmatprep.subr.bf16.mxu1 %v2838_v38  ;;  %v2808_v38 = vld [vmem:[#allocation2 + $0x7ec] ss:$24 sps:$4 sm:$0xff]  }
 0x3b2   :  { %2094 = vmatpush1.bf16.msra.mxu1 %v2836_v39  ;;  %v2806_v39 = vld [vmem:[#allocation2 + $0x7e8] ss:$24 sps:$4 sm:$0xff]  }
 0x3b3   :  { %2095 = vmatprep.subr.bf16.mxu1 %v2844_v40  ;;  %v2811_v40 = vld [vmem:[#allocation2 + $0x81c] ss:$24 sps:$4 sm:$0xff]  }
 0x3b6   :  { %2096 = vmatpush1.bf16.msra.mxu1 %v2842_v41  ;;  %v2809_v41 = vld [vmem:[#allocation2 + $0x818] ss:$24 sps:$4 sm:$0xff]  }
 0x47c   :  { %v286_v51 = vpop.f32.mrb[4].mxu1 }
 0x47d   :  { %v292_v53 = vadd.f32 %v286_v51, %v3267_v30  ;;  %v2690_v54 = vpop.f32.mrb[5].mxu1  ;;  %v2880_v51 = vld [vmem:[#allocation2 + $0x1b4] ss:$24 sps:$4 sm:$0xff]  }
 0x47e   :  { %v289_v55 = vpop.f32.mrb[6].mxu1  ;;  %v2884_v54 = vld [vmem:[#allocation2 + $0x1e0] ss:$24 sps:$4 sm:$0xff]  }
 0x47f   :  { %v297_v56 = vadd.f32 %v295_v52, %v292_v53  ;;  %v2691_v57 = vpop.f32.mrb[7].mxu1  ;;  %v2878_v52 = vld [vmem:[#allocation2 + $0x1b0] ss:$24 sps:$4 sm:$0xff]   ;;  %v2886_v53 = vld [vmem:[#allocation2 + $0x1e4] ss:$24 sps:$4 sm:$0xff]  }
 0x480   :  { %v2892_v55 = vld [vmem:[#allocation2 + $0x214] ss:$24 sps:$4 sm:$0xff]   ;;  %v2898_v57 = vld [vmem:[#allocation2 + $0x244] ss:$24 sps:$4 sm:$0xff]  }
 0x481   :  { %v306_v59 = vpack.c.bf16 %v297_v56, %v297_v56  ;;  %299 = vrot.lane.b32.xlu1 %v297_v56, %s3192_s0  ;;  %v2890_v56 = vld [vmem:[#allocation2 + $0x210] ss:$24 sps:$4 sm:$0xff]  }
 0x483   :  { %2391 = vmatmul.mubr.msk.bf16.vlgmr.msra.gmra.mrb[8].mxu0 %vm71_vm1, %v306_v59  ;;  %v2896_v59 = vld [vmem:[#allocation2 + $0x240] ss:$24 sps:$4 sm:$0xff]  }
 0x484   :  { %800 = vmatpush1.bf16.msra.mxu0 %v2728_v58  ;;  %v313_v58 = vsub.s32 3, %v3252_v6 }
 0x485   :  { %801 = vmatprep.subr.bf16.mxu0 %v2733_v60  ;;  %v387_v60 = vsub.s32 4, %v3252_v6 }
 0x488   :  { %802 = vmatpush1.bf16.msra.mxu0 %v2731_v61  ;;  %v2904_v61 = vld [vmem:[#allocation2 + $0x274] ss:$24 sps:$4 sm:$0xff]  }
 0x489   :  { %803 = vmatprep.subr.bf16.mxu0 %v2736_v62  ;;  %v314_v62 = vrot.slane %v3255_v8, %v313_v58 }
 0x48c   :  { %804 = vmatpush1.bf16.msra.mxu0 %v2734_v63  ;;  %v2902_v63 = vld [vmem:[#allocation2 + $0x270] ss:$24 sps:$4 sm:$0xff]  }
 0x48d   :  { %805 = vmatprep.subr.bf16.mxu0 %v2739_v0  ;;  %v318_v0 = vrot.slane %v3272_v34, %v313_v58  ;;  %v2851_v58 = vld [vmem:[#allocation2 + $0xc8] ss:$24 sps:$4 sm:$0xff]  }
 0x490   :  { %806 = vmatpush1.bf16.msra.mxu0 %v2737_v1  ;;  %v388_v1 = vrot.slane %v3255_v8, %v387_v60 }
 0x491   :  { %807 = vmatprep.subr.bf16.mxu0 %v2742_v2 }
 0x494   :  { %808 = vmatpush1.bf16.msra.mxu0 %v2740_v3  ;;  %v392_v3 = vrot.slane %v3272_v34, %v387_v60  ;;  %v2857_v60 = vld [vmem:[#allocation2 + $0xf8] ss:$24 sps:$4 sm:$0xff]  }
 0x495   :  { %809 = vmatprep.subr.bf16.mxu0 %v2745_v4 }
 0x498   :  { %810 = vmatpush1.bf16.msra.mxu0 %v2743_v5 }
 0x499   :  { %811 = vmatprep.subr.bf16.mxu0 %v2748_v7 }
 0x49c   :  { %812 = vmatpush1.bf16.msra.mxu0 %v2746_v9 }
 0x49d   :  { %813 = vmatprep.subr.bf16.mxu0 %v2751_v10 }
 0x4a0   :  { %814 = vmatpush1.bf16.msra.mxu0 %v2749_v11 }
 0x4a1   :  { %815 = vmatprep.subr.bf16.mxu0 %v2754_v12 }
 0x4a4   :  { %816 = vmatpush1.bf16.msra.mxu0 %v2752_v13 }
 0x4a5   :  { %817 = vmatprep.subr.bf16.mxu0 %v2757_v14 }
 0x4a8   :  { %818 = vmatpush1.bf16.msra.mxu0 %v2755_v15 }
 0x4a9   :  { %819 = vmatprep.subr.bf16.mxu0 %v2760_v16  ;;  %v2776_v16 = vld [vmem:[#allocation2 + $0x608] ss:$24 sps:$4 sm:$0xff]  }
 0x4ac   :  { %820 = vmatpush1.bf16.msra.mxu0 %v2758_v17 }
 0x4ad   :  { %821 = vmatprep.subr.bf16.mxu0 %v2763_v18  ;;  %v2781_v18 = vld [vmem:[#allocation2 + $0x63c] ss:$24 sps:$4 sm:$0xff]  }
 0x4b0   :  { %822 = vmatpush1.bf16.msra.mxu0 %v2761_v19  ;;  %v2779_v19 = vld [vmem:[#allocation2 + $0x638] ss:$24 sps:$4 sm:$0xff]  }
 0x4b1   :  { %823 = vmatprep.subr.bf16.mxu0 %v2766_v20  ;;  %v2784_v20 = vld [vmem:[#allocation2 + $0x66c] ss:$24 sps:$4 sm:$0xff]  }
 0x4b4   :  { %824 = vmatpush1.bf16.msra.mxu0 %v2764_v21  ;;  %v2782_v21 = vld [vmem:[#allocation2 + $0x668] ss:$24 sps:$4 sm:$0xff]  }
 0x4b5   :  { %825 = vmatprep.subr.bf16.mxu0 %v2769_v22  ;;  %v2787_v22 = vld [vmem:[#allocation2 + $0x69c] ss:$24 sps:$4 sm:$0xff]  }
 0x4b8   :  { %826 = vmatpush1.bf16.msra.mxu0 %v2767_v23  ;;  %v2785_v23 = vld [vmem:[#allocation2 + $0x698] ss:$24 sps:$4 sm:$0xff]  }
 0x4b9   :  { %827 = vmatprep.subr.bf16.mxu0 %v2772_v24  ;;  %v2790_v24 = vld [vmem:[#allocation2 + $0x6cc] ss:$24 sps:$4 sm:$0xff]  }
 0x4bc   :  { %828 = vmatpush1.bf16.msra.mxu0 %v2770_v25  ;;  %v2788_v25 = vld [vmem:[#allocation2 + $0x6c8] ss:$24 sps:$4 sm:$0xff]  }
 0x4bd   :  { %829 = vmatprep.subr.bf16.mxu0 %v2775_v26  ;;  %v2793_v26 = vld [vmem:[#allocation2 + $0x6fc] ss:$24 sps:$4 sm:$0xff]  }
 0x4c0   :  { %830 = vmatpush1.bf16.msra.mxu0 %v2773_v27  ;;  %v2791_v27 = vld [vmem:[#allocation2 + $0x6f8] ss:$24 sps:$4 sm:$0xff]  }
 0x4c1   :  { %840 = vmatprep.subr.bf16.mxu0 %v2778_v28  ;;  %v2796_v28 = vld [vmem:[#allocation2 + $0x72c] ss:$24 sps:$4 sm:$0xff]  }
 0x4f3   :  { %v300_v29 = vpop.permute.xlu1 %299 }
 0x4f4   :  { %v302_v31 = vsel %vm71_vm1, %v3267_v30, %v300_v29  ;;  %v2850_v30 = vld [vmem:[#allocation2 + $0xc4] ss:$24 sps:$4 sm:$0xff]   ;;  %v2794_v29 = vld [vmem:[#allocation2 + $0x728] ss:$24 sps:$4 sm:$0xff]  }
 0x4f5   :  { %v304_v32 = vsel %vm303_vm4, %v302_v31, 0.0  ;;  %2097 = vmatprep.subr.bf16.mxu1 %v2850_v30  ;;  %v2799_v31 = vld [vmem:[#allocation2 + $0x75c] ss:$24 sps:$4 sm:$0xff]   ;;  %v2814_v30 = vld [vmem:[#allocation2 + $0x84c] ss:$24 sps:$4 sm:$0xff]  }
 0x4f6   :  { %305 = vst [vmem:[%s3365_s3] sm:$0xff] %v304_v32  ;;  %2098 = vmatpush1.bf16.msra.mxu1 %v2848_v42  ;;  %v2797_v32 = vld [vmem:[#allocation2 + $0x758] ss:$24 sps:$4 sm:$0xff]   ;;  %v2812_v42 = vld [vmem:[#allocation2 + $0x848] ss:$24 sps:$4 sm:$0xff]  }
 0x4f7   :  { %2099 = vmatprep.subr.bf16.mxu1 %v2856_v43  ;;  %v2817_v43 = vld [vmem:[#allocation2 + $0x87c] ss:$24 sps:$4 sm:$0xff]  }
 0x4fa   :  { %2100 = vmatpush1.bf16.msra.mxu1 %v2854_v44  ;;  %v2815_v44 = vld [vmem:[#allocation2 + $0x878] ss:$24 sps:$4 sm:$0xff]  }
 0x4fb   :  { %2101 = vmatprep.subr.bf16.mxu1 %v2862_v45  ;;  %v2820_v45 = vld [vmem:[#allocation2 + $0x8ac] ss:$24 sps:$4 sm:$0xff]  }
 0x4fe   :  { %2102 = vmatpush1.bf16.msra.mxu1 %v2860_v46  ;;  %v2818_v46 = vld [vmem:[#allocation2 + $0x8a8] ss:$24 sps:$4 sm:$0xff]  }
 0x4ff   :  { %2103 = vmatprep.subr.bf16.mxu1 %v2868_v47  ;;  %v2823_v47 = vld [vmem:[#allocation2 + $0x8dc] ss:$24 sps:$4 sm:$0xff]  }
 0x502   :  { %2104 = vmatpush1.bf16.msra.mxu1 %v2866_v48  ;;  %v2821_v48 = vld [vmem:[#allocation2 + $0x8d8] ss:$24 sps:$4 sm:$0xff]  }
 0x503   :  { %2105 = vmatprep.subr.bf16.mxu1 %v2874_v49  ;;  %v2829_v49 = vld [vmem:[#allocation2 + $0xc] ss:$24 sps:$4 sm:$0xff]  }
 0x506   :  { %2106 = vmatpush1.bf16.msra.mxu1 %v2872_v50  ;;  %v2827_v50 = vld [vmem:[#allocation2 + $0x8] ss:$24 sps:$4 sm:$0xff]  }
 0x507   :  { %2107 = vmatprep.subr.bf16.mxu1 %v2880_v51  ;;  %v2835_v51 = vld [vmem:[#allocation2 + $0x3c] ss:$24 sps:$4 sm:$0xff]  }
 0x50a   :  { %2108 = vmatpush1.bf16.msra.mxu1 %v2878_v52  ;;  %v2833_v52 = vld [vmem:[#allocation2 + $0x38] ss:$24 sps:$4 sm:$0xff]  }
 0x50b   :  { %2109 = vmatprep.subr.bf16.mxu1 %v2886_v53  ;;  %v2841_v53 = vld [vmem:[#allocation2 + $0x6c] ss:$24 sps:$4 sm:$0xff]  }
 0x50e   :  { %2110 = vmatpush1.bf16.msra.mxu1 %v2884_v54  ;;  %v2839_v54 = vld [vmem:[#allocation2 + $0x68] ss:$24 sps:$4 sm:$0xff]  }
 0x50f   :  { %2111 = vmatprep.subr.bf16.mxu1 %v2892_v55  ;;  %v2847_v55 = vld [vmem:[#allocation2 + $0x9c] ss:$24 sps:$4 sm:$0xff]  }
 0x512   :  { %2112 = vmatpush1.bf16.msra.mxu1 %v2890_v56  ;;  %v2845_v56 = vld [vmem:[#allocation2 + $0x98] ss:$24 sps:$4 sm:$0xff]  }
 0x513   :  { %2113 = vmatprep.subr.bf16.mxu1 %v2898_v57  ;;  %v2853_v57 = vld [vmem:[#allocation2 + $0xcc] ss:$24 sps:$4 sm:$0xff]  }
 0x516   :  { %2114 = vmatpush1.bf16.msra.mxu1 %v2896_v59  ;;  %v2859_v59 = vld [vmem:[#allocation2 + $0xfc] ss:$24 sps:$4 sm:$0xff]  }
 0x517   :  { %2115 = vmatprep.subr.bf16.mxu1 %v2904_v61  ;;  %v2865_v61 = vld [vmem:[#allocation2 + $0x12c] ss:$24 sps:$4 sm:$0xff]  }
 0x51a   :  { %2116 = vmatpush1.bf16.msra.mxu1 %v2902_v63  ;;  %v2908_v63 = vld [vmem:[#allocation2 + $0x2a0] ss:$24 sps:$4 sm:$0xff]  }
 0x556   :  { %v376_v2 = vpop.f32.mrb[8].mxu0 }
 0x557   :  { %v377_v4 = vadd.f32 %v376_v2, %v314_v62  ;;  %v378_v5 = vpop.f32.mrb[9].mxu0  ;;  %v2910_v62 = vld [vmem:[#allocation2 + $0x2a4] ss:$24 sps:$4 sm:$0xff]   ;;  %v2916_v2 = vld [vmem:[#allocation2 + $0x2d4] ss:$24 sps:$4 sm:$0xff]  }
 0x558   :  { %v379_v7 = vadd.f32 %v378_v5, %v318_v0  ;;  %v380_v9 = vpop.f32.mrb[10].mxu0  ;;  %v2863_v0 = vld [vmem:[#allocation2 + $0x128] ss:$24 sps:$4 sm:$0xff]   ;;  %2117 = vmatprep.subr.bf16.mxu1 %v2910_v62  ;;  %v2877_v5 = vld [vmem:[#allocation2 + $0x18c] ss:$24 sps:$4 sm:$0xff]  }
 0x559   :  { %vm383_vm5 = vcmp.ge.f32.partialorder %v377_v4, 0.0  ;;  %v393_v10 = vmul.f32 %v388_v1, %v377_v4  ;;  %v381_v11 = vpop.f32.mrb[11].mxu0  ;;  %v2871_v1 = vld [vmem:[#allocation2 + $0x15c] ss:$24 sps:$4 sm:$0xff]   ;;  %2118 = vmatpush1.bf16.msra.mxu1 %v2908_v63  ;;  %v2875_v9 = vld [vmem:[#allocation2 + $0x188] ss:$24 sps:$4 sm:$0xff]  }
 0x55a   :  { %vm384_vm6 = vcmp.ge.f32.partialorder %v379_v7, 0.0  ;;  %v394_v12 = vmul.f32 %v392_v3, %v379_v7  ;;  %v2914_v3 = vld [vmem:[#allocation2 + $0x2d0] ss:$24 sps:$4 sm:$0xff]   ;;  %2119 = vmatprep.subr.bf16.mxu1 %v2916_v2  ;;  %v2956_v2 = vld [vmem:[#allocation2 + $0x420] ss:$24 sps:$4 sm:$0xff]  }
 0x55b   :  { %v395_v13 = vsel %vm383_vm5, %v377_v4, %v393_v10  ;;  %v2869_v4 = vld [vmem:[#allocation2 + $0x158] ss:$24 sps:$4 sm:$0xff]   ;;  %v2883_v10 = vld [vmem:[#allocation2 + $0x1bc] ss:$24 sps:$4 sm:$0xff]  }
 0x55c   :  { %v396_v14 = vsel %vm384_vm6, %v379_v7, %v394_v12  ;;  %v3291_v17 = vpack.c.bf16 %v395_v13, %v395_v13  ;;  %v2922_v7 = vld [vmem:[#allocation2 + $0x304] ss:$24 sps:$4 sm:$0xff]   ;;  %v2881_v11 = vld [vmem:[#allocation2 + $0x1b8] ss:$24 sps:$4 sm:$0xff]   ;;  %v2887_v13 = vld [vmem:[#allocation2 + $0x1e8] ss:$24 sps:$4 sm:$0xff]  }
 0x55d   :  { %v398_v15 = vpack.c.bf16 %v396_v14, %v396_v14  ;;  %2120 = vmatpush1.bf16.msra.mxu1 %v2914_v3  ;;  %v2889_v12 = vld [vmem:[#allocation2 + $0x1ec] ss:$24 sps:$4 sm:$0xff]   ;;  %v2895_v14 = vld [vmem:[#allocation2 + $0x21c] ss:$24 sps:$4 sm:$0xff]   ;;  %v2950_v62 = vld [vmem:[#allocation2 + $0x3f0] ss:$24 sps:$4 sm:$0xff]  }
 0x55e   :  { %2130 = vmatprep.subr.bf16.mxu1 %v2922_v7  ;;  %v2953_v63 = vld [vmem:[#allocation2 + $0x3f8] ss:$24 sps:$4 sm:$0xff]   ;;  %v2959_v3 = vld [vmem:[#allocation2 + $0x428] ss:$24 sps:$4 sm:$0xff]  }
 0x55f   :  { %831 = vmatprep.mubr.bf16.mxu0 %v398_v15  ;;  %v2962_v7 = vld [vmem:[#allocation2 + $0x450] ss:$24 sps:$4 sm:$0xff]  }
 0x560   :  { %832 = vmatmul.mubr.bf16.vlgmr.msra.gmra.mrb[12].mxu0 %v3291_v17 }
 0x561   :  { %841 = vmatpush1.bf16.msra.mxu0 %v2776_v16  ;;  %872 = vmatprep.mubr.bf16.mxu0 %v398_v15  ;;  %v2893_v15 = vld [vmem:[#allocation2 + $0x218] ss:$24 sps:$4 sm:$0xff]   ;;  %v2901_v16 = vld [vmem:[#allocation2 + $0x24c] ss:$24 sps:$4 sm:$0xff]  }
 0x562   :  { %842 = vmatprep.subr.bf16.mxu0 %v2781_v18  ;;  %v2907_v18 = vld [vmem:[#allocation2 + $0x27c] ss:$24 sps:$4 sm:$0xff]  }
 0x565   :  { %843 = vmatpush1.bf16.msra.mxu0 %v2779_v19  ;;  %v2905_v19 = vld [vmem:[#allocation2 + $0x278] ss:$24 sps:$4 sm:$0xff]  }
 0x566   :  { %844 = vmatprep.subr.bf16.mxu0 %v2784_v20  ;;  %v2913_v20 = vld [vmem:[#allocation2 + $0x2ac] ss:$24 sps:$4 sm:$0xff]  }
 0x569   :  { %845 = vmatpush1.bf16.msra.mxu0 %v2782_v21  ;;  %v2911_v21 = vld [vmem:[#allocation2 + $0x2a8] ss:$24 sps:$4 sm:$0xff]  }
 0x56a   :  { %846 = vmatprep.subr.bf16.mxu0 %v2787_v22  ;;  %v2919_v22 = vld [vmem:[#allocation2 + $0x2dc] ss:$24 sps:$4 sm:$0xff]  }
 0x56d   :  { %847 = vmatpush1.bf16.msra.mxu0 %v2785_v23  ;;  %v2917_v23 = vld [vmem:[#allocation2 + $0x2d8] ss:$24 sps:$4 sm:$0xff]  }
 0x56e   :  { %848 = vmatprep.subr.bf16.mxu0 %v2790_v24  ;;  %v2925_v24 = vld [vmem:[#allocation2 + $0x30c] ss:$24 sps:$4 sm:$0xff]  }
 0x571   :  { %849 = vmatpush1.bf16.msra.mxu0 %v2788_v25  ;;  %v3296_v25 = vsub.s32 1, %v3252_v6 }
 0x572   :  { %850 = vmatprep.subr.bf16.mxu0 %v2793_v26  ;;  %v3299_v26 = vsub.s32 2, %v3252_v6 }
 0x575   :  { %851 = vmatpush1.bf16.msra.mxu0 %v2791_v27  ;;  %v466_v27 = vrot.slane %v3255_v8, %v3296_v25 }
 0x576   :  { %852 = vmatprep.subr.bf16.mxu0 %v2796_v28  ;;  %v470_v28 = vrot.slane %v3272_v34, %v3296_v25 }
 0x579   :  { %853 = vmatpush1.bf16.msra.mxu0 %v2794_v29  ;;  %v888_v29 = vrot.slane %v3255_v8, %v3299_v26 }
 0x57a   :  { %854 = vmatprep.subr.bf16.mxu0 %v2799_v31 }
 0x57d   :  { %855 = vmatpush1.bf16.msra.mxu0 %v2797_v32  ;;  %v892_v32 = vrot.slane %v3272_v34, %v3299_v26  ;;  %v2926_v34 = vld [vmem:[#allocation2 + $0x330] ss:$24 sps:$4 sm:$0xff]  }
 0x57e   :  { %856 = vmatprep.subr.bf16.mxu0 %v2802_v33 }
 0x581   :  { %857 = vmatpush1.bf16.msra.mxu0 %v2800_v35 }
 0x582   :  { %858 = vmatprep.subr.bf16.mxu0 %v2805_v36 }
 0x585   :  { %859 = vmatpush1.bf16.msra.mxu0 %v2803_v37 }
 0x586   :  { %860 = vmatprep.subr.bf16.mxu0 %v2808_v38 }
 0x589   :  { %861 = vmatpush1.bf16.msra.mxu0 %v2806_v39 }
 0x58a   :  { %862 = vmatprep.subr.bf16.mxu0 %v2811_v40 }
 0x58d   :  { %863 = vmatpush1.bf16.msra.mxu0 %v2809_v41 }
 0x58e   :  { %864 = vmatprep.subr.bf16.mxu0 %v2814_v30 }
 0x591   :  { %865 = vmatpush1.bf16.msra.mxu0 %v2812_v42 }
 0x592   :  { %866 = vmatprep.subr.bf16.mxu0 %v2817_v43  ;;  %v2920_v43 = vld [vmem:[#allocation2 + $0x300] ss:$24 sps:$4 sm:$0xff]  }
 0x595   :  { %867 = vmatpush1.bf16.msra.mxu0 %v2815_v44  ;;  %v2923_v44 = vld [vmem:[#allocation2 + $0x308] ss:$24 sps:$4 sm:$0xff]  }
 0x596   :  { %868 = vmatprep.subr.bf16.mxu0 %v2820_v45  ;;  %v2928_v45 = vld [vmem:[#allocation2 + $0x334] ss:$24 sps:$4 sm:$0xff]  }
 0x599   :  { %869 = vmatpush1.bf16.msra.mxu0 %v2818_v46  ;;  %v2931_v46 = vld [vmem:[#allocation2 + $0x33c] ss:$24 sps:$4 sm:$0xff]  }
 0x59a   :  { %870 = vmatprep.subr.bf16.mxu0 %v2823_v47  ;;  %v2929_v47 = vld [vmem:[#allocation2 + $0x338] ss:$24 sps:$4 sm:$0xff]  }
 0x59d   :  { %871 = vmatpush1.bf16.msra.mxu0 %v2821_v48  ;;  %v2934_v48 = vld [vmem:[#allocation2 + $0x364] ss:$24 sps:$4 sm:$0xff]  }
 0x59e   :  { %2171 = vmatprep.subr.bf16.mxu0 %v2829_v49  ;;  %v2937_v49 = vld [vmem:[#allocation2 + $0x36c] ss:$24 sps:$4 sm:$0xff]  }
 0x5a0   :  { %873 = vmatmul.mubr.bf16.vlgmr.msra.gmra.mrb[16].mxu0 %v3291_v17  ;;  %v2899_v17 = vld [vmem:[#allocation2 + $0x248] ss:$24 sps:$4 sm:$0xff]  }
 0x5a1   :  { %2172 = vmatpush1.bf16.msra.mxu0 %v2827_v50  ;;  %v2932_v50 = vld [vmem:[#allocation2 + $0x360] ss:$24 sps:$4 sm:$0xff]  }
 0x5a2   :  { %2173 = vmatprep.subr.bf16.mxu0 %v2835_v51  ;;  %v2935_v51 = vld [vmem:[#allocation2 + $0x368] ss:$24 sps:$4 sm:$0xff]  }
 0x5a5   :  { %2174 = vmatpush1.bf16.msra.mxu0 %v2833_v52  ;;  %v2940_v52 = vld [vmem:[#allocation2 + $0x394] ss:$24 sps:$4 sm:$0xff]  }
 0x5a6   :  { %2175 = vmatprep.subr.bf16.mxu0 %v2841_v53  ;;  %v2943_v53 = vld [vmem:[#allocation2 + $0x39c] ss:$24 sps:$4 sm:$0xff]  }
 0x5a9   :  { %2176 = vmatpush1.bf16.msra.mxu0 %v2839_v54  ;;  %v2938_v54 = vld [vmem:[#allocation2 + $0x390] ss:$24 sps:$4 sm:$0xff]  }
 0x5aa   :  { %2177 = vmatprep.subr.bf16.mxu0 %v2847_v55  ;;  %v2941_v55 = vld [vmem:[#allocation2 + $0x398] ss:$24 sps:$4 sm:$0xff]  }
 0x5ad   :  { %2178 = vmatpush1.bf16.msra.mxu0 %v2845_v56  ;;  %v2946_v56 = vld [vmem:[#allocation2 + $0x3c4] ss:$24 sps:$4 sm:$0xff]  }
 0x5ae   :  { %2179 = vmatprep.subr.bf16.mxu0 %v2853_v57  ;;  %v2949_v57 = vld [vmem:[#allocation2 + $0x3cc] ss:$24 sps:$4 sm:$0xff]  }
 0x5b1   :  { %2180 = vmatpush1.bf16.msra.mxu0 %v2851_v58  ;;  %v2944_v58 = vld [vmem:[#allocation2 + $0x3c0] ss:$24 sps:$4 sm:$0xff]  }
 0x5b2   :  { %2181 = vmatprep.subr.bf16.mxu0 %v2859_v59  ;;  %v2947_v59 = vld [vmem:[#allocation2 + $0x3c8] ss:$24 sps:$4 sm:$0xff]  }
 0x5b5   :  { %2182 = vmatpush1.bf16.msra.mxu0 %v2857_v60  ;;  %v2952_v60 = vld [vmem:[#allocation2 + $0x3f4] ss:$24 sps:$4 sm:$0xff]  }
 0x5b6   :  { %2183 = vmatprep.subr.bf16.mxu0 %v2865_v61  ;;  %v2955_v61 = vld [vmem:[#allocation2 + $0x3fc] ss:$24 sps:$4 sm:$0xff]  }
 0x5b9   :  { %2184 = vmatpush1.bf16.msra.mxu0 %v2863_v0  ;;  %v2958_v0 = vld [vmem:[#allocation2 + $0x424] ss:$24 sps:$4 sm:$0xff]  }
 0x5ba   :  { %2185 = vmatprep.subr.bf16.mxu0 %v2871_v1  ;;  %v2961_v1 = vld [vmem:[#allocation2 + $0x42c] ss:$24 sps:$4 sm:$0xff]  }
 0x5bd   :  { %2186 = vmatpush1.bf16.msra.mxu0 %v2869_v4  ;;  %v2964_v4 = vld [vmem:[#allocation2 + $0x454] ss:$24 sps:$4 sm:$0xff]  }
 0x5be   :  { %2187 = vmatprep.subr.bf16.mxu0 %v2877_v5  ;;  %v2967_v5 = vld [vmem:[#allocation2 + $0x45c] ss:$24 sps:$4 sm:$0xff]  }
 0x5c1   :  { %2188 = vmatpush1.bf16.msra.mxu0 %v2875_v9  ;;  %v2965_v9 = vld [vmem:[#allocation2 + $0x458] ss:$24 sps:$4 sm:$0xff]  }
 0x5c2   :  { %2189 = vmatprep.subr.bf16.mxu0 %v2883_v10  ;;  %v2970_v10 = vld [vmem:[#allocation2 + $0x484] ss:$24 sps:$4 sm:$0xff]  }
 0x5c5   :  { %2190 = vmatpush1.bf16.msra.mxu0 %v2881_v11  ;;  %v2973_v11 = vld [vmem:[#allocation2 + $0x48c] ss:$24 sps:$4 sm:$0xff]  }
 0x5c6   :  { %2191 = vmatprep.subr.bf16.mxu0 %v2889_v12  ;;  %v2968_v12 = vld [vmem:[#allocation2 + $0x480] ss:$24 sps:$4 sm:$0xff]  }
 0x5c9   :  { %2192 = vmatpush1.bf16.msra.mxu0 %v2887_v13  ;;  %v2971_v13 = vld [vmem:[#allocation2 + $0x488] ss:$24 sps:$4 sm:$0xff]  }
 0x5ca   :  { %2193 = vmatprep.subr.bf16.mxu0 %v2895_v14  ;;  %v2976_v14 = vld [vmem:[#allocation2 + $0x4b4] ss:$24 sps:$4 sm:$0xff]  }
 0x5cd   :  { %2194 = vmatpush1.bf16.msra.mxu0 %v2893_v15  ;;  %v2979_v15 = vld [vmem:[#allocation2 + $0x4bc] ss:$24 sps:$4 sm:$0xff]  }
 0x5ce   :  { %2195 = vmatprep.subr.bf16.mxu0 %v2901_v16  ;;  %v2974_v16 = vld [vmem:[#allocation2 + $0x4b0] ss:$24 sps:$4 sm:$0xff]  }
 0x5d1   :  { %2196 = vmatpush1.bf16.msra.mxu0 %v2899_v17  ;;  %v2977_v17 = vld [vmem:[#allocation2 + $0x4b8] ss:$24 sps:$4 sm:$0xff]  }
 0x5d2   :  { %2197 = vmatprep.subr.bf16.mxu0 %v2907_v18  ;;  %v2982_v18 = vld [vmem:[#allocation2 + $0x4e4] ss:$24 sps:$4 sm:$0xff]  }
 0x5d5   :  { %2198 = vmatpush1.bf16.msra.mxu0 %v2905_v19  ;;  %v2985_v19 = vld [vmem:[#allocation2 + $0x4ec] ss:$24 sps:$4 sm:$0xff]  }
 0x5d6   :  { %2199 = vmatprep.subr.bf16.mxu0 %v2913_v20  ;;  %v2980_v20 = vld [vmem:[#allocation2 + $0x4e0] ss:$24 sps:$4 sm:$0xff]  }
 0x5d9   :  { %2200 = vmatpush1.bf16.msra.mxu0 %v2911_v21  ;;  %v2983_v21 = vld [vmem:[#allocation2 + $0x4e8] ss:$24 sps:$4 sm:$0xff]  }
 0x5da   :  { %2201 = vmatprep.subr.bf16.mxu0 %v2919_v22  ;;  %v2988_v22 = vld [vmem:[#allocation2 + $0x514] ss:$24 sps:$4 sm:$0xff]  }
 0x5dd   :  { %2202 = vmatpush1.bf16.msra.mxu0 %v2917_v23  ;;  %v2991_v23 = vld [vmem:[#allocation2 + $0x51c] ss:$24 sps:$4 sm:$0xff]  }
 0x5de   :  { %2212 = vmatprep.subr.bf16.mxu0 %v2925_v24  ;;  %v2986_v24 = vld [vmem:[#allocation2 + $0x510] ss:$24 sps:$4 sm:$0xff]  }
 0x633   :  { %v833_v31 = vpop.f32.mrb[12].mxu0 }
 0x634   :  { %v834_v33 = vadd.f32 %v833_v31, %v466_v27  ;;  %v835_v35 = vpop.f32.mrb[13].mxu0  ;;  %v2989_v27 = vld [vmem:[#allocation2 + $0x518] ss:$24 sps:$4 sm:$0xff]  }
 0x635   :  { %v836_v36 = vadd.f32 %v835_v35, %v470_v28  ;;  %v837_v37 = vpop.f32.mrb[14].mxu0  ;;  %v2994_v28 = vld [vmem:[#allocation2 + $0x544] ss:$24 sps:$4 sm:$0xff]   ;;  %v2992_v31 = vld [vmem:[#allocation2 + $0x540] ss:$24 sps:$4 sm:$0xff]  }
 0x636   :  { %vm881_vm7 = vcmp.ge.f32.partialorder %v834_v33, 0.0  ;;  %v901_v38 = vmul.f32 %v888_v29, %v834_v33  ;;  %v838_v39 = vpop.f32.mrb[15].mxu0  ;;  %v2997_v29 = vld [vmem:[#allocation2 + $0x54c] ss:$24 sps:$4 sm:$0xff]   ;;  %v3003_v35 = vld [vmem:[#allocation2 + $0x57c] ss:$24 sps:$4 sm:$0xff]  }
 0x637   :  { %vm882_vm8 = vcmp.ge.f32.partialorder %v836_v36, 0.0  ;;  %v902_v40 = vmul.f32 %v892_v32, %v836_v36  ;;  %v2995_v32 = vld [vmem:[#allocation2 + $0x548] ss:$24 sps:$4 sm:$0xff]   ;;  %v3319_v39 = vld [vmem:[#allocation4 + $0x18] sm:$0xff] }
 0x638   :  { %v905_v41 = vsel %vm881_vm7, %v834_v33, %v901_v38  ;;  %v3000_v33 = vld [vmem:[#allocation2 + $0x574] ss:$24 sps:$4 sm:$0xff]   ;;  %v2998_v37 = vld [vmem:[#allocation2 + $0x570] ss:$24 sps:$4 sm:$0xff]  }
 0x639   :  { %v906_v30 = vsel %vm882_vm8, %v836_v36, %v902_v40  ;;  %v3311_v8 = vpack.c.bf16 %v905_v41, %v905_v41  ;;  %v3317_v36 = vld [vmem:[#allocation4 + $0x10] sm:$0xff]  ;;  %v3006_v40 = vld [vmem:[#allocation2 + $0x5a4] ss:$24 sps:$4 sm:$0xff]  }
 0x63a   :  { %v3309_v42 = vpack.c.bf16 %v906_v30, %v906_v30  ;;  %v3001_v38 = vld [vmem:[#allocation2 + $0x578] ss:$24 sps:$4 sm:$0xff]   ;;  %v3009_v41 = vld [vmem:[#allocation2 + $0x5ac] ss:$24 sps:$4 sm:$0xff]   ;;  %v474_v30 = vrot.slane %v3317_v36, %v3296_v25 }
 0x63c   :  { %2121 = vmatprep.mubr.bf16.mxu1 %v3309_v42  ;;  %2203 = vmatprep.mubr.bf16.mxu0 %v3309_v42 }
 0x63d   :  { %2122 = vmatmul.mubr.bf16.vlgmr.msra.gmra.mrb[8].mxu1 %v3311_v8  ;;  %2204 = vmatmul.mubr.bf16.vlgmr.msra.gmra.mrb[20].mxu0 %v3311_v8 }
 0x63e   :  { %2131 = vmatpush1.bf16.msra.mxu1 %v2920_v43  ;;  %2213 = vmatpush1.bf16.msra.mxu0 %v2923_v44  ;;  %v478_v43 = vrot.slane %v3319_v39, %v3296_v25  ;;  %v896_v44 = vrot.slane %v3317_v36, %v3299_v26 }
 0x63f   :  { %2132 = vmatprep.subr.bf16.mxu1 %v2928_v45  ;;  %2214 = vmatprep.subr.bf16.mxu0 %v2931_v46  ;;  %v3004_v45 = vld [vmem:[#allocation2 + $0x5a0] ss:$24 sps:$4 sm:$0xff]  }
 0x640   :  { %v3007_v46 = vld [vmem:[#allocation2 + $0x5a8] ss:$24 sps:$4 sm:$0xff]  }
 0x642   :  { %2133 = vmatpush1.bf16.msra.mxu1 %v2926_v34  ;;  %2215 = vmatpush1.bf16.msra.mxu0 %v2929_v47  ;;  %v900_v47 = vrot.slane %v3319_v39, %v3299_v26  ;;  %v3018_v26 = vld [vmem:[#allocation2 + $0x14] ss:$24 sps:$4 sm:$0xff]  }
 0x643   :  { %2134 = vmatprep.subr.bf16.mxu1 %v2934_v48  ;;  %2216 = vmatprep.subr.bf16.mxu0 %v2937_v49  ;;  %v3012_v48 = vld [vmem:[#allocation2 + $0x5d4] ss:$24 sps:$4 sm:$0xff]  }
 0x644   :  { %v3015_v49 = vld [vmem:[#allocation2 + $0x5dc] ss:$24 sps:$4 sm:$0xff]  }
 0x646   :  { %2135 = vmatpush1.bf16.msra.mxu1 %v2932_v50  ;;  %2217 = vmatpush1.bf16.msra.mxu0 %v2935_v51 }
 0x647   :  { %2136 = vmatprep.subr.bf16.mxu1 %v2940_v52  ;;  %2218 = vmatprep.subr.bf16.mxu0 %v2943_v53 }
 0x64a   :  { %2137 = vmatpush1.bf16.msra.mxu1 %v2938_v54  ;;  %2219 = vmatpush1.bf16.msra.mxu0 %v2941_v55  ;;  %v3010_v55 = vld [vmem:[#allocation2 + $0x5d0] ss:$24 sps:$4 sm:$0xff]  }
 0x64b   :  { %2138 = vmatprep.subr.bf16.mxu1 %v2946_v56  ;;  %2220 = vmatprep.subr.bf16.mxu0 %v2949_v57  ;;  %v3013_v56 = vld [vmem:[#allocation2 + $0x5d8] ss:$24 sps:$4 sm:$0xff]  }
 0x64e   :  { %2139 = vmatpush1.bf16.msra.mxu1 %v2944_v58  ;;  %2221 = vmatpush1.bf16.msra.mxu0 %v2947_v59 }
 0x64f   :  { %2140 = vmatprep.subr.bf16.mxu1 %v2952_v60  ;;  %2222 = vmatprep.subr.bf16.mxu0 %v2955_v61  ;;  %v3016_v61 = vld [vmem:[#allocation2 + $0x10] ss:$24 sps:$4 sm:$0xff]  }
 0x652   :  { %2141 = vmatpush1.bf16.msra.mxu1 %v2950_v62  ;;  %2223 = vmatpush1.bf16.msra.mxu0 %v2953_v63  ;;  %v3021_v63 = vld [vmem:[#allocation2 + $0x44] ss:$24 sps:$4 sm:$0xff]  }
 0x653   :  { %2142 = vmatprep.subr.bf16.mxu1 %v2958_v0  ;;  %2224 = vmatprep.subr.bf16.mxu0 %v2961_v1  ;;  %v3019_v0 = vld [vmem:[#allocation2 + $0x40] ss:$24 sps:$4 sm:$0xff]   ;;  %v3024_v1 = vld [vmem:[#allocation2 + $0x74] ss:$24 sps:$4 sm:$0xff]  }
 0x656   :  { %2143 = vmatpush1.bf16.msra.mxu1 %v2956_v2  ;;  %2225 = vmatpush1.bf16.msra.mxu0 %v2959_v3  ;;  %v3022_v2 = vld [vmem:[#allocation2 + $0x70] ss:$24 sps:$4 sm:$0xff]   ;;  %v3027_v3 = vld [vmem:[#allocation2 + $0xa4] ss:$24 sps:$4 sm:$0xff]  }
 0x657   :  { %2144 = vmatprep.subr.bf16.mxu1 %v2964_v4  ;;  %2226 = vmatprep.subr.bf16.mxu0 %v2967_v5  ;;  %v3025_v4 = vld [vmem:[#allocation2 + $0xa0] ss:$24 sps:$4 sm:$0xff]   ;;  %v3030_v5 = vld [vmem:[#allocation2 + $0xd4] ss:$24 sps:$4 sm:$0xff]  }
 0x65a   :  { %2145 = vmatpush1.bf16.msra.mxu1 %v2962_v7  ;;  %2227 = vmatpush1.bf16.msra.mxu0 %v2965_v9  ;;  %v3028_v7 = vld [vmem:[#allocation2 + $0xd0] ss:$24 sps:$4 sm:$0xff]   ;;  %v3033_v9 = vld [vmem:[#allocation2 + $0x104] ss:$24 sps:$4 sm:$0xff]  }
 0x65b   :  { %2146 = vmatprep.subr.bf16.mxu1 %v2970_v10  ;;  %2228 = vmatprep.subr.bf16.mxu0 %v2973_v11  ;;  %v3031_v10 = vld [vmem:[#allocation2 + $0x100] ss:$24 sps:$4 sm:$0xff]   ;;  %v3036_v11 = vld [vmem:[#allocation2 + $0x134] ss:$24 sps:$4 sm:$0xff]  }
 0x65e   :  { %2147 = vmatpush1.bf16.msra.mxu1 %v2968_v12  ;;  %2229 = vmatpush1.bf16.msra.mxu0 %v2971_v13  ;;  %v3039_v12 = vld [vmem:[#allocation2 + $0x164] ss:$24 sps:$4 sm:$0xff]   ;;  %v3037_v13 = vld [vmem:[#allocation2 + $0x160] ss:$24 sps:$4 sm:$0xff]  }
 0x65f   :  { %2148 = vmatprep.subr.bf16.mxu1 %v2976_v14  ;;  %2230 = vmatprep.subr.bf16.mxu0 %v2979_v15  ;;  %v3042_v14 = vld [vmem:[#allocation2 + $0x194] ss:$24 sps:$4 sm:$0xff]   ;;  %v3040_v15 = vld [vmem:[#allocation2 + $0x190] ss:$24 sps:$4 sm:$0xff]  }
 0x662   :  { %2149 = vmatpush1.bf16.msra.mxu1 %v2974_v16  ;;  %2231 = vmatpush1.bf16.msra.mxu0 %v2977_v17  ;;  %v3045_v16 = vld [vmem:[#allocation2 + $0x1c4] ss:$24 sps:$4 sm:$0xff]   ;;  %v3043_v17 = vld [vmem:[#allocation2 + $0x1c0] ss:$24 sps:$4 sm:$0xff]  }
 0x663   :  { %2150 = vmatprep.subr.bf16.mxu1 %v2982_v18  ;;  %2232 = vmatprep.subr.bf16.mxu0 %v2985_v19  ;;  %v3048_v18 = vld [vmem:[#allocation2 + $0x1f4] ss:$24 sps:$4 sm:$0xff]   ;;  %v3046_v19 = vld [vmem:[#allocation2 + $0x1f0] ss:$24 sps:$4 sm:$0xff]  }
 0x666   :  { %2151 = vmatpush1.bf16.msra.mxu1 %v2980_v20  ;;  %2233 = vmatpush1.bf16.msra.mxu0 %v2983_v21  ;;  %v3051_v20 = vld [vmem:[#allocation2 + $0x224] ss:$24 sps:$4 sm:$0xff]   ;;  %v3049_v21 = vld [vmem:[#allocation2 + $0x220] ss:$24 sps:$4 sm:$0xff]  }
 0x667   :  { %2152 = vmatprep.subr.bf16.mxu1 %v2988_v22  ;;  %2234 = vmatprep.subr.bf16.mxu0 %v2991_v23  ;;  %v3054_v22 = vld [vmem:[#allocation2 + $0x254] ss:$24 sps:$4 sm:$0xff]   ;;  %v3052_v23 = vld [vmem:[#allocation2 + $0x250] ss:$24 sps:$4 sm:$0xff]  }
 0x66a   :  { %2153 = vmatpush1.bf16.msra.mxu1 %v2986_v24  ;;  %2235 = vmatpush1.bf16.msra.mxu0 %v2989_v27  ;;  %v3057_v24 = vld [vmem:[#allocation2 + $0x284] ss:$24 sps:$4 sm:$0xff]   ;;  %v3055_v27 = vld [vmem:[#allocation2 + $0x280] ss:$24 sps:$4 sm:$0xff]  }
 0x66b   :  { %2154 = vmatprep.subr.bf16.mxu1 %v2994_v28  ;;  %2236 = vmatprep.subr.bf16.mxu0 %v2997_v29  ;;  %v3060_v28 = vld [vmem:[#allocation2 + $0x2b4] ss:$24 sps:$4 sm:$0xff]   ;;  %v3058_v29 = vld [vmem:[#allocation2 + $0x2b0] ss:$24 sps:$4 sm:$0xff]  }
 0x66e   :  { %2155 = vmatpush1.bf16.msra.mxu1 %v2992_v31  ;;  %2237 = vmatpush1.bf16.msra.mxu0 %v2995_v32  ;;  %v3063_v31 = vld [vmem:[#allocation2 + $0x2e4] ss:$24 sps:$4 sm:$0xff]   ;;  %v3061_v32 = vld [vmem:[#allocation2 + $0x2e0] ss:$24 sps:$4 sm:$0xff]  }
 0x66f   :  { %2156 = vmatprep.subr.bf16.mxu1 %v3000_v33  ;;  %2238 = vmatprep.subr.bf16.mxu0 %v3003_v35  ;;  %v3066_v33 = vld [vmem:[#allocation2 + $0x314] ss:$24 sps:$4 sm:$0xff]   ;;  %v3064_v35 = vld [vmem:[#allocation2 + $0x310] ss:$24 sps:$4 sm:$0xff]  }
 0x672   :  { %2157 = vmatpush1.bf16.msra.mxu1 %v2998_v37  ;;  %2239 = vmatpush1.bf16.msra.mxu0 %v3001_v38  ;;  %v3069_v37 = vld [vmem:[#allocation2 + $0x344] ss:$24 sps:$4 sm:$0xff]   ;;  %v3067_v38 = vld [vmem:[#allocation2 + $0x340] ss:$24 sps:$4 sm:$0xff]  }
 0x673   :  { %v874_v34 = vpop.f32.mrb[16].mxu0  ;;  %2158 = vmatprep.subr.bf16.mxu1 %v3006_v40  ;;  %2240 = vmatprep.subr.bf16.mxu0 %v3009_v41  ;;  %v3072_v40 = vld [vmem:[#allocation2 + $0x374] ss:$24 sps:$4 sm:$0xff]   ;;  %v3070_v41 = vld [vmem:[#allocation2 + $0x370] ss:$24 sps:$4 sm:$0xff]  }
 0x674   :  { %v875_v50 = vadd.f32 %v874_v34, %v474_v30  ;;  %v876_v51 = vpop.f32.mrb[17].mxu0  ;;  %v3075_v30 = vld [vmem:[#allocation2 + $0x3a4] ss:$24 sps:$4 sm:$0xff]   ;;  %v3084_v34 = vld [vmem:[#allocation2 + $0x434] ss:$24 sps:$4 sm:$0xff]  }
 0x675   :  { %v877_v52 = vadd.f32 %v876_v51, %v478_v43  ;;  %v878_v53 = vpop.f32.mrb[18].mxu0  ;;  %v3073_v43 = vld [vmem:[#allocation2 + $0x3a0] ss:$24 sps:$4 sm:$0xff]   ;;  %v3088_v51 = vld [vmem:[#allocation2 + $0x490] ss:$24 sps:$4 sm:$0xff]  }
 0x676   :  { %vm883_vm9 = vcmp.ge.f32.partialorder %v875_v50, 0.0  ;;  %v903_v25 = vmul.f32 %v896_v44, %v875_v50  ;;  %v879_v54 = vpop.f32.mrb[19].mxu0  ;;  %2159 = vmatpush1.bf16.msra.mxu1 %v3004_v45  ;;  %2241 = vmatpush1.bf16.msra.mxu0 %v3007_v46  ;;  %v3078_v44 = vld [vmem:[#allocation2 + $0x3d4] ss:$24 sps:$4 sm:$0xff]   ;;  %v3076_v45 = vld [vmem:[#allocation2 + $0x3d0] ss:$24 sps:$4 sm:$0xff]  }
 0x677   :  { %vm884_vm10 = vcmp.ge.f32.partialorder %v877_v52, 0.0  ;;  %v904_v57 = vmul.f32 %v900_v47, %v877_v52  ;;  %2160 = vmatprep.subr.bf16.mxu1 %v3012_v48  ;;  %2242 = vmatprep.subr.bf16.mxu0 %v3015_v49  ;;  %v3081_v46 = vld [vmem:[#allocation2 + $0x404] ss:$24 sps:$4 sm:$0xff]   ;;  %v3082_v47 = vld [vmem:[#allocation2 + $0x430] ss:$24 sps:$4 sm:$0xff]  }
 0x678   :  { %v907_v58 = vsel %vm883_vm9, %v875_v50, %v903_v25  ;;  %v3087_v48 = vld [vmem:[#allocation2 + $0x464] ss:$24 sps:$4 sm:$0xff]   ;;  %v3085_v49 = vld [vmem:[#allocation2 + $0x460] ss:$24 sps:$4 sm:$0xff]   ;;  %v3090_v50 = vld [vmem:[#allocation2 + $0x494] ss:$24 sps:$4 sm:$0xff]  }
 0x679   :  { %v908_v59 = vsel %vm884_vm10, %v877_v52, %v904_v57  ;;  %v3331_v62 = vpack.c.bf16 %v907_v58, %v907_v58  ;;  %v3093_v52 = vld [vmem:[#allocation2 + $0x4c4] ss:$24 sps:$4 sm:$0xff]   ;;  %v3091_v53 = vld [vmem:[#allocation2 + $0x4c0] ss:$24 sps:$4 sm:$0xff]   ;;  %v3096_v25 = vld [vmem:[#allocation2 + $0x4f4] ss:$24 sps:$4 sm:$0xff]  }
 0x67a   :  { %2161 = vmatpush1.bf16.msra.mxu1 %v3010_v55  ;;  %2243 = vmatpush1.bf16.msra.mxu0 %v3013_v56  ;;  %v3329_v60 = vpack.c.bf16 %v908_v59, %v908_v59  ;;  %v3094_v54 = vld [vmem:[#allocation2 + $0x4f0] ss:$24 sps:$4 sm:$0xff]   ;;  %v3099_v55 = vld [vmem:[#allocation2 + $0x524] ss:$24 sps:$4 sm:$0xff]   ;;  %v3097_v56 = vld [vmem:[#allocation2 + $0x520] ss:$24 sps:$4 sm:$0xff]  }
 0x67b   :  { %2253 = vmatprep.subr.bf16.mxu1 %v3018_v26  ;;  %v3102_v57 = vld [vmem:[#allocation2 + $0x554] ss:$24 sps:$4 sm:$0xff]   ;;  %v3100_v26 = vld [vmem:[#allocation2 + $0x550] ss:$24 sps:$4 sm:$0xff]   ;;  %v3105_v58 = vld [vmem:[#allocation2 + $0x584] ss:$24 sps:$4 sm:$0xff]  }
 0x67c   :  { %2162 = vmatprep.mubr.bf16.mxu1 %v3329_v60  ;;  %2244 = vmatprep.mubr.bf16.mxu0 %v3329_v60  ;;  %v3103_v59 = vld [vmem:[#allocation2 + $0x580] ss:$24 sps:$4 sm:$0xff]  }
 0x67d   :  { %2163 = vmatmul.mubr.bf16.vlgmr.msra.gmra.mrb[8].mxu1 %v3331_v62  ;;  %2245 = vmatmul.mubr.bf16.vlgmr.msra.gmra.mrb[20].mxu0 %v3331_v62 }
 0x67e   :  { %2254 = vmatpush1.bf16.msra.mxu1 %v3016_v61  ;;  %2285 = vmatprep.mubr.bf16.mxu1 %v3309_v42  ;;  %v3034_v42 = vld [vmem:[#allocation2 + $0x130] ss:$24 sps:$4 sm:$0xff]  }
 0x67f   :  { %2255 = vmatprep.subr.bf16.mxu1 %v3021_v63  ;;  %v3106_v61 = vld [vmem:[#allocation2 + $0x5b0] ss:$24 sps:$4 sm:$0xff]   ;;  %v3111_v63 = vld [vmem:[#allocation2 + $0x5e4] ss:$24 sps:$4 sm:$0xff]  }
 0x682   :  { %2256 = vmatpush1.bf16.msra.mxu1 %v3019_v0  ;;  %v3109_v0 = vld [vmem:[#allocation2 + $0x5e0] ss:$24 sps:$4 sm:$0xff]  }
 0x683   :  { %2257 = vmatprep.subr.bf16.mxu1 %v3024_v1  ;;  %v1107_v1 = vsub.s32 0, %v3252_v6 }
 0x686   :  { %2258 = vmatpush1.bf16.msra.mxu1 %v3022_v2  ;;  %v3136_v2 = vld [vmem:[#allocation4] sm:$0xff] }
 0x687   :  { %2259 = vmatprep.subr.bf16.mxu1 %v3027_v3  ;;  %v1108_v3 = vrot.slane %v3136_v2, %v1107_v1 }
 0x68a   :  { %2260 = vmatpush1.bf16.msra.mxu1 %v3025_v4  ;;  %v1116_v4 = vrot.slane %v3317_v36, %v1107_v1 }
 0x68b   :  { %2261 = vmatprep.subr.bf16.mxu1 %v3030_v5  ;;  %v3137_v5 = vld [vmem:[#allocation4 + $0x8] sm:$0xff] }
 0x68e   :  { %2262 = vmatpush1.bf16.msra.mxu1 %v3028_v7  ;;  %v1112_v7 = vrot.slane %v3137_v5, %v1107_v1 }
 0x68f   :  { %2263 = vmatprep.subr.bf16.mxu1 %v3033_v9  ;;  %v1120_v9 = vrot.slane %v3319_v39, %v1107_v1 }
 0x692   :  { %2264 = vmatpush1.bf16.msra.mxu1 %v3031_v10 }
 0x693   :  { %2265 = vmatprep.subr.bf16.mxu1 %v3036_v11 }
 0x696   :  { %2266 = vmatpush1.bf16.msra.mxu1 %v3034_v42 }
 0x697   :  { %2267 = vmatprep.subr.bf16.mxu1 %v3039_v12 }
 0x69a   :  { %2268 = vmatpush1.bf16.msra.mxu1 %v3037_v13 }
 0x69b   :  { %2269 = vmatprep.subr.bf16.mxu1 %v3042_v14 }
 0x69e   :  { %2270 = vmatpush1.bf16.msra.mxu1 %v3040_v15 }
 0x69f   :  { %2271 = vmatprep.subr.bf16.mxu1 %v3045_v16 }
 0x6a2   :  { %2272 = vmatpush1.bf16.msra.mxu1 %v3043_v17 }
 0x6a3   :  { %2273 = vmatprep.subr.bf16.mxu1 %v3048_v18 }
 0x6a6   :  { %2274 = vmatpush1.bf16.msra.mxu1 %v3046_v19 }
 0x6a7   :  { %2275 = vmatprep.subr.bf16.mxu1 %v3051_v20 }
 0x6aa   :  { %2276 = vmatpush1.bf16.msra.mxu1 %v3049_v21 }
 0x6ab   :  { %2277 = vmatprep.subr.bf16.mxu1 %v3054_v22 }
 0x6ae   :  { %2278 = vmatpush1.bf16.msra.mxu1 %v3052_v23 }
 0x6af   :  { %2279 = vmatprep.subr.bf16.mxu1 %v3057_v24 }
 0x6b2   :  { %2280 = vmatpush1.bf16.msra.mxu1 %v3055_v27 }
 0x6b3   :  { %2281 = vmatprep.subr.bf16.mxu1 %v3060_v28 }
 0x6b6   :  { %2282 = vmatpush1.bf16.msra.mxu1 %v3058_v29 }
 0x6b7   :  { %2283 = vmatprep.subr.bf16.mxu1 %v3063_v31 }
 0x6ba   :  { %2284 = vmatpush1.bf16.msra.mxu1 %v3061_v32 }
 0x6bb   :  { %2294 = vmatprep.subr.bf16.mxu1 %v3066_v33 }
 0x6bd   :  { %2286 = vmatmul.mubr.bf16.vlgmr.msra.gmra.mrb[12].mxu1 %v3311_v8  ;;  %v3079_v8 = vld [vmem:[#allocation2 + $0x400] ss:$24 sps:$4 sm:$0xff]  }
 0x6be   :  { %2295 = vmatpush1.bf16.msra.mxu1 %v3064_v35  ;;  %2326 = vmatprep.mubr.bf16.mxu1 %v3329_v60  ;;  %v3108_v60 = vld [vmem:[#allocation2 + $0x5b4] ss:$24 sps:$4 sm:$0xff]  }
 0x6bf   :  { %2296 = vmatprep.subr.bf16.mxu1 %v3069_v37 }
 0x6c2   :  { %2297 = vmatpush1.bf16.msra.mxu1 %v3067_v38 }
 0x6c3   :  { %2298 = vmatprep.subr.bf16.mxu1 %v3072_v40 }
 0x6c6   :  { %2299 = vmatpush1.bf16.msra.mxu1 %v3070_v41 }
 0x6c7   :  { %2300 = vmatprep.subr.bf16.mxu1 %v3075_v30 }
 0x6ca   :  { %2301 = vmatpush1.bf16.msra.mxu1 %v3073_v43  ;;  %v48_v43 = vld [vmem:[#allocation4 + $0x20] sm:$0xff] }
 0x6cb   :  { %2302 = vmatprep.subr.bf16.mxu1 %v3078_v44  ;;  %v49_v44 = vld [vmem:[#allocation4 + $0x28] sm:$0xff] }
 0x6ce   :  { %2303 = vmatpush1.bf16.msra.mxu1 %v3076_v45  ;;  %v1124_v45 = vrot.slane %v48_v43, %v1107_v1 }
 0x6cf   :  { %2304 = vmatprep.subr.bf16.mxu1 %v3081_v46  ;;  %v1128_v46 = vrot.slane %v49_v44, %v1107_v1 }
 0x6d2   :  { %2305 = vmatpush1.bf16.msra.mxu1 %v3079_v8 }
 0x6d3   :  { %2306 = vmatprep.subr.bf16.mxu1 %v3084_v34 }
 0x6d6   :  { %2307 = vmatpush1.bf16.msra.mxu1 %v3082_v47 }
 0x6d7   :  { %2308 = vmatprep.subr.bf16.mxu1 %v3087_v48 }
 0x6da   :  { %2309 = vmatpush1.bf16.msra.mxu1 %v3085_v49 }
 0x6db   :  { %2310 = vmatprep.subr.bf16.mxu1 %v3090_v50 }
 0x6de   :  { %2311 = vmatpush1.bf16.msra.mxu1 %v3088_v51 }
 0x6df   :  { %2312 = vmatprep.subr.bf16.mxu1 %v3093_v52 }
 0x6e2   :  { %2313 = vmatpush1.bf16.msra.mxu1 %v3091_v53 }
 0x6e3   :  { %2314 = vmatprep.subr.bf16.mxu1 %v3096_v25 }
 0x6e6   :  { %2315 = vmatpush1.bf16.msra.mxu1 %v3094_v54 }
 0x6e7   :  { %2316 = vmatprep.subr.bf16.mxu1 %v3099_v55 }
 0x6ea   :  { %2317 = vmatpush1.bf16.msra.mxu1 %v3097_v56 }
 0x6eb   :  { %2318 = vmatprep.subr.bf16.mxu1 %v3102_v57 }
 0x6ee   :  { %2319 = vmatpush1.bf16.msra.mxu1 %v3100_v26 }
 0x6ef   :  { %2320 = vmatprep.subr.bf16.mxu1 %v3105_v58 }
 0x6f2   :  { %2321 = vmatpush1.bf16.msra.mxu1 %v3103_v59 }
 0x6f3   :  { %2322 = vmatprep.subr.bf16.mxu1 %v3108_v60 }
 0x6f6   :  { %2323 = vmatpush1.bf16.msra.mxu1 %v3106_v61 }
 0x6f7   :  { %2324 = vmatprep.subr.bf16.mxu1 %v3111_v63 }
 0x6fa   :  { %2325 = vmatpush1.bf16.msra.mxu1 %v3109_v0 }
 0x6fd   :  { %2327 = vmatmul.mubr.bf16.vlgmr.msra.gmra.mrb[12].mxu1 %v3331_v62 }
 0x750   :  { %v2164_v10 = vpop.f32.mrb[8].mxu1  ;;  %v2246_v11 = vpop.f32.mrb[20].mxu0 }
 0x751   :  { %v2692_v42 = vadd.f32 %v2164_v10, %v1108_v3  ;;  %v2694_v12 = vadd.f32 %v2246_v11, %v1116_v4  ;;  %v2166_v13 = vpop.f32.mrb[9].mxu1  ;;  %v2248_v14 = vpop.f32.mrb[21].mxu0 }
 0x752   :  { %v2693_v15 = vadd.f32 %v2166_v13, %v1112_v7  ;;  %v2695_v16 = vadd.f32 %v2248_v14, %v1120_v9  ;;  %v2168_v17 = vpop.f32.mrb[10].mxu1  ;;  %v2250_v62 = vpop.f32.mrb[22].mxu0 }
 0x753   :  { %v2335_v18 = vsub.f32 0.0, %v2692_v42  ;;  %v2337_v6 = vsub.f32 0.0, %v2694_v12  ;;  %v2169_v19 = vpop.f32.mrb[11].mxu1  ;;  %v2251_v20 = vpop.f32.mrb[23].mxu0 }
 0x754   :  { %v2336_v21 = vsub.f32 0.0, %v2693_v15  ;;  %v2338_v36 = vsub.f32 0.0, %v2695_v16 }
 0x755   :  { %v2341_v22 = vmul.f32 1.442695, %v2335_v18  ;;  %v2345_v23 = vmul.f32 1.442695, %v2337_v6 }
 0x756   :  { %v2343_v24 = vmul.f32 1.442695, %v2336_v21  ;;  %v2347_v39 = vmul.f32 1.442695, %v2338_v36 }
 0x757   :  { %3112 = vpow2.f32 %v2341_v22 }
 0x758   :  { %3114 = vpow2.f32 %v2345_v23 }
 0x759   :  { %3116 = vpow2.f32 %v2343_v24 }
 0x75a   :  { %3118 = vpow2.f32 %v2347_v39 }
 0x761   :  { %v3113_v27 = vpop.eup %3112 }
 0x762   :  { %v3115_v28 = vpop.eup %3114  ;;  %v2353_v29 = vadd.f32 1.0, %v3113_v27 }
 0x763   :  { %v3117_v31 = vpop.eup %3116  ;;  %v2355_v32 = vadd.f32 1.0, %v3115_v28 }
 0x764   :  { %v3119_v33 = vpop.eup %3118  ;;  %3120 = vrcp.f32 %v2353_v29  ;;  %v2354_v35 = vadd.f32 1.0, %v3117_v31 }
 0x765   :  { %3122 = vrcp.f32 %v2355_v32  ;;  %v2356_v37 = vadd.f32 1.0, %v3119_v33 }
 0x766   :  { %3124 = vrcp.f32 %v2354_v35 }
 0x767   :  { %3126 = vrcp.f32 %v2356_v37 }
 0x76e   :  { %v3121_v38 = vpop.eup %3120 }
 0x76f   :  { %v3123_v40 = vpop.eup %3122  ;;  %2365 = vst [vmem:[%s3366_s4] sm:$0xff] %v3121_v38 }
 0x770   :  { %v3125_v41 = vpop.eup %3124  ;;  %2367 = vst [vmem:[%s3366_s4 + $0x10] sm:$0xff] %v3123_v40 }
 0x771   :  { %v3127_v30 = vpop.eup %3126  ;;  %2366 = vst [vmem:[%s3366_s4 + $0x8] sm:$0xff] %v3125_v41 }
 0x772   :  { %2368 = vst [vmem:[%s3366_s4 + $0x18] sm:$0xff] %v3127_v30 }
 0x7d0   :  { %v2328_v8 = vpop.f32.mrb[12].mxu1 }
 0x7d1   :  { %v2696_v34 = vadd.f32 %v2328_v8, %v1124_v45  ;;  %v2330_v47 = vpop.f32.mrb[13].mxu1 }
 0x7d2   :  { %v2697_v48 = vadd.f32 %v2330_v47, %v1128_v46  ;;  %v2332_v49 = vpop.f32.mrb[14].mxu1 }
 0x7d3   :  { %v2339_v50 = vsub.f32 0.0, %v2696_v34  ;;  %v2333_v51 = vpop.f32.mrb[15].mxu1 }
 0x7d4   :  { %v2340_v52 = vsub.f32 0.0, %v2697_v48 }
 0x7d5   :  { %v2349_v53 = vmul.f32 1.442695, %v2339_v50 }
 0x7d6   :  { %v2351_v25 = vmul.f32 1.442695, %v2340_v52 }
 0x7d7   :  { %3128 = vpow2.f32 %v2349_v53 }
 0x7d8   :  { %3130 = vpow2.f32 %v2351_v25 }
 0x7e1   :  { %v3129_v54 = vpop.eup %3128 }
 0x7e2   :  { %v3131_v55 = vpop.eup %3130  ;;  %v2357_v56 = vadd.f32 1.0, %v3129_v54 }
 0x7e3   :  { %v2358_v57 = vadd.f32 1.0, %v3131_v55 }
 0x7e4   :  { %3132 = vrcp.f32 %v2357_v56 }
 0x7e5   :  { %3134 = vrcp.f32 %v2358_v57 }
 0x7ee   :  { %v3133_v26 = vpop.eup %3132 }
 0x7ef   :  { %v3135_v58 = vpop.eup %3134  ;;  %2369 = vst [vmem:[%s3366_s4 + $0x20] sm:$0xff] %v3133_v26 }
 0x7f0   :  { %2370 = vst [vmem:[%s3366_s4 + $0x28] sm:$0xff] %v3135_v58 }
 0x7f1   :  { %2379 = vsyncpa [#allocation3], 1 }
 0x7f2   :  { %2380 = vsyncpa [#allocation5], 1 }

</bundles_post_ra>
